<compile_context>
chip_gen: v6e
topology: v6e:2x2x1
jax: 0.10.0
libtpu: 0.0.40
codegen_flags: <defaults>
</compile_context>

<pallas_src>
import jax
import jax.numpy as jnp
from jax.experimental import pallas as pl
from jax.experimental.pallas import tpu as pltpu

BN_EPS = 1e-5
VMEM_LIMIT_BYTES = 32 * 1024 * 1024


def _choose_tm(M):
    """Pick an M (lane-axis) tile size that divides M; prefer ~512-wide tiles."""
    if M <= 512:
        return M
    for tm in (512, 384, 256, 128):
        if M % tm == 0:
            return tm
    return M  # fallback: single tile


# ----------------------------- Pallas kernels ------------------------------

def _matmul_bn_relu_t_fused_kernel(wt_ref, at_ref, g_ref, beta_ref, o_ref):
    """Single step: O^T = ReLU(BN_batch(W^T @ A^T)).  Whole M in one tile."""
    y = jnp.dot(wt_ref[...], at_ref[...],
                preferred_element_type=jnp.float32)              # (Cout, M)
    m_total = y.shape[1]
    mean = jnp.sum(y, axis=1, keepdims=True) / m_total
    var = jnp.sum(y * y, axis=1, keepdims=True) / m_total - mean * mean
    scale = g_ref[...] * jax.lax.rsqrt(var + BN_EPS)
    shift = beta_ref[...] - mean * scale
    o_ref[...] = jnp.maximum(y * scale + shift, 0.0)


def _matmul_bn_relu_t_tiled_kernel(wt_ref, at_ref, g_ref, beta_ref, o_ref,
                                   sum_ref, ssq_ref):
    """O^T = BN_relu(W^T @ A^T).  Grid axis 0 = M tiles plus one finalize step.

    Steps 0..nm-1 : y = W^T @ A^T tile written into the VMEM-resident output
                    block; per-channel sum / sum-of-squares accumulated.
    Step nm       : batch stats finalized; output normalized + ReLU in place.
    """
    i = pl.program_id(0)
    n_tiles = pl.num_programs(0) - 1
    tm = at_ref.shape[1]
    m_total = o_ref.shape[1]

    @pl.when(i == 0)
    def _init():
        sum_ref[...] = jnp.zeros_like(sum_ref)
        ssq_ref[...] = jnp.zeros_like(ssq_ref)

    @pl.when(i < n_tiles)
    def _compute():
        y = jnp.dot(wt_ref[...], at_ref[...],
                    preferred_element_type=jnp.float32)          # (Cout, tm)
        start = pl.multiple_of(i * tm, tm)
        o_ref[:, pl.ds(start, tm)] = y
        sum_ref[...] += jnp.sum(y, axis=1, keepdims=True)
        ssq_ref[...] += jnp.sum(y * y, axis=1, keepdims=True)

    @pl.when(i == n_tiles)
    def _finalize():
        mean = sum_ref[...] / m_total
        var = ssq_ref[...] / m_total - mean * mean               # biased var
        scale = g_ref[...] * jax.lax.rsqrt(var + BN_EPS)
        shift = beta_ref[...] - mean * scale
        o_ref[...] = jnp.maximum(o_ref[...] * scale + shift, 0.0)


def _matmul_bias_t_kernel(wt_ref, at_ref, b_ref, o_ref):
    o_ref[...] = jnp.dot(wt_ref[...], at_ref[...],
                         preferred_element_type=jnp.float32) + b_ref[...]


def _bilinear_x2_kernel(mh_ref, mwT_ref, x_ref, o_ref):
    # separable bilinear x2: out = Mh @ X @ Mw^T, static loop over planes
    B = x_ref.shape[0]
    mh = mh_ref[...]
    mwT = mwT_ref[...]
    for b in range(B):
        t = jnp.dot(mh, x_ref[b], preferred_element_type=jnp.float32)   # (2h, w)
        o_ref[b] = jnp.dot(t, mwT, preferred_element_type=jnp.float32)  # (2h, 2w)


# --------------------------- pallas_call wrappers ---------------------------

def pallas_matmul_bn_relu_t(wt, at, gamma, beta):
    Cout, K = wt.shape
    _, M = at.shape
    tm = _choose_tm(M)
    nm = M // tm
    wt = wt.astype(jnp.float32)
    at = at.astype(jnp.float32)
    g2 = gamma.reshape(Cout, 1).astype(jnp.float32)
    b2 = beta.reshape(Cout, 1).astype(jnp.float32)

    if nm == 1:
        # fast path: whole layer in one grid step, no scratch, no finalize
        return pl.pallas_call(
            _matmul_bn_relu_t_fused_kernel,
            grid=(1,),
            in_specs=[pl.BlockSpec((Cout, K), lambda i: (0, 0)),
                      pl.BlockSpec((K, M), lambda i: (0, 0)),
                      pl.BlockSpec((Cout, 1), lambda i: (0, 0)),
                      pl.BlockSpec((Cout, 1), lambda i: (0, 0))],
            out_specs=pl.BlockSpec((Cout, M), lambda i: (0, 0)),
            out_shape=jax.ShapeDtypeStruct((Cout, M), jnp.float32),
            compiler_params=pltpu.CompilerParams(
                dimension_semantics=("arbitrary",),
                vmem_limit_bytes=VMEM_LIMIT_BYTES),
        )(wt, at, g2, b2)

    # general path: tile over M, accumulate batch stats, finalize in place
    a_idx = lambda i: (0, jnp.minimum(i, nm - 1))    # clamp for finalize step
    return pl.pallas_call(
        _matmul_bn_relu_t_tiled_kernel,
        grid=(nm + 1,),
        in_specs=[pl.BlockSpec((Cout, K), lambda i: (0, 0)),
                  pl.BlockSpec((K, tm), a_idx),
                  pl.BlockSpec((Cout, 1), lambda i: (0, 0)),
                  pl.BlockSpec((Cout, 1), lambda i: (0, 0))],
        out_specs=pl.BlockSpec((Cout, M), lambda i: (0, 0)),
        out_shape=jax.ShapeDtypeStruct((Cout, M), jnp.float32),
        scratch_shapes=[pltpu.VMEM((Cout, 1), jnp.float32),
                        pltpu.VMEM((Cout, 1), jnp.float32)],
        compiler_params=pltpu.CompilerParams(
            dimension_semantics=("arbitrary",),
            vmem_limit_bytes=VMEM_LIMIT_BYTES),
    )(wt, at, g2, b2)


def pallas_matmul_bias_t(wt, at, bias):
    Cout, K = wt.shape
    _, M = at.shape
    tm = _choose_tm(M)
    nm = M // tm
    return pl.pallas_call(
        _matmul_bias_t_kernel,
        grid=(nm,),
        in_specs=[pl.BlockSpec((Cout, K), lambda i: (0, 0)),
                  pl.BlockSpec((K, tm), lambda i: (0, i)),
                  pl.BlockSpec((Cout, 1), lambda i: (0, 0))],
        out_specs=pl.BlockSpec((Cout, tm), lambda i: (0, i)),
        out_shape=jax.ShapeDtypeStruct((Cout, M), jnp.float32),
        compiler_params=pltpu.CompilerParams(
            dimension_semantics=("parallel",),
            vmem_limit_bytes=VMEM_LIMIT_BYTES),
    )(wt.astype(jnp.float32), at.astype(jnp.float32),
      bias.reshape(Cout, 1).astype(jnp.float32))


def pallas_bilinear_x2(x_bhw):
    B, H, W = x_bhw.shape
    Mh = bilinear_upsample_matrix(H)           # (2H, H)
    MwT = bilinear_upsample_matrix(W).T        # (W, 2W)
    return pl.pallas_call(
        _bilinear_x2_kernel,
        grid=(1,),
        in_specs=[pl.BlockSpec((2 * H, H), lambda i: (0, 0)),
                  pl.BlockSpec((W, 2 * W), lambda i: (0, 0)),
                  pl.BlockSpec((B, H, W), lambda i: (0, 0, 0))],
        out_specs=pl.BlockSpec((B, 2 * H, 2 * W), lambda i: (0, 0, 0)),
        out_shape=jax.ShapeDtypeStruct((B, 2 * H, 2 * W), jnp.float32),
        compiler_params=pltpu.CompilerParams(
            dimension_semantics=("arbitrary",),
            vmem_limit_bytes=VMEM_LIMIT_BYTES),
    )(Mh, MwT, x_bhw.astype(jnp.float32))


# ------------------------------- JAX glue -----------------------------------

def im2col_T(x_nhwc, kh, kw, stride, pad):
    """A^T:(K=kh*kw*Cin, M=N*Hout*Wout); K order ((i*kw+j)*Cin + c), lane = M."""
    N, H, W, C = x_nhwc.shape
    xp = jnp.pad(x_nhwc, ((0, 0), (pad, pad), (pad, pad), (0, 0)))
    Hout = (H + 2 * pad - kh) // stride + 1
    Wout = (W + 2 * pad - kw) // stride + 1
    cols = []
    for i in range(kh):
        for j in range(kw):
            cols.append(xp[:, i:i + stride * Hout:stride,
                           j:j + stride * Wout:stride, :])
    a = jnp.stack(cols, axis=0)                  # (kh*kw, N, Hout, Wout, C)
    aT = jnp.transpose(a, (0, 4, 1, 2, 3))       # (kh*kw, C, N, Hout, Wout)
    return aT.reshape(kh * kw * C, N * Hout * Wout), N, Hout, Wout


def conv_weight_matrix_T(w_oihw):
    # (Cout, Cin, kh, kw) -> (Cout, kh*kw*Cin), matching im2col_T K order
    Cout, Cin, kh, kw = w_oihw.shape
    return jnp.transpose(w_oihw, (0, 2, 3, 1)).reshape(Cout, kh * kw * Cin)


def convtranspose_weight_matrix_T(w_iohw):
    # ConvTranspose2d weight (Cin, Cout, kh, kw) -> equivalent fwd-conv matrix
    w_flip = w_iohw[:, :, ::-1, ::-1]
    w_fwd = jnp.transpose(w_flip, (1, 0, 2, 3))  # (Cout, Cin, kh, kw)
    return conv_weight_matrix_T(w_fwd)


def zero_dilate(x_nhwc, stride):
    N, H, W, C = x_nhwc.shape
    out = jnp.zeros((N, (H - 1) * stride + 1, (W - 1) * stride + 1, C),
                    x_nhwc.dtype)
    return out.at[:, ::stride, ::stride, :].set(x_nhwc)


def conv_bn_relu(x_nhwc, w, gamma, beta, stride, pad):
    # NOTE: the conv bias is intentionally unused — a per-channel constant
    # added before training-mode BatchNorm is exactly cancelled by the mean.
    Cout, Cin, kh, kw = w.shape
    at, N, Hout, Wout = im2col_T(x_nhwc, kh, kw, stride, pad)
    o = pallas_matmul_bn_relu_t(conv_weight_matrix_T(w), at, gamma, beta)
    return jnp.transpose(o.reshape(Cout, N, Hout, Wout), (1, 2, 3, 0))


def convtranspose_bn_relu(x_nhwc, w, gamma, beta, stride, pad):
    # TODO(synk): sub-pixel decomposition (4 interleaved 2x2 convs) would avoid
    # the 75%-structural-zero dilated im2col; kept the dilation form for now.
    Cin, Cout, kh, kw = w.shape
    xd = zero_dilate(x_nhwc, stride)
    at, N, Hout, Wout = im2col_T(xd, kh, kw, 1, kh - 1 - pad)
    o = pallas_matmul_bn_relu_t(convtranspose_weight_matrix_T(w), at,
                                gamma, beta)
    return jnp.transpose(o.reshape(Cout, N, Hout, Wout), (1, 2, 3, 0))


def bilinear_upsample_matrix(S):
    # PyTorch bilinear, scale_factor=2, align_corners=False
    out = 2 * S
    dst = jnp.arange(out, dtype=jnp.float32)
    src = (dst + 0.5) / 2.0 - 0.5
    src = jnp.maximum(src, 0.0)
    lo = jnp.floor(src).astype(jnp.int32)
    hi = jnp.minimum(lo + 1, S - 1)
    w_hi = src - lo.astype(jnp.float32)
    w_lo = 1.0 - w_hi
    M = jnp.zeros((out, S), jnp.float32)
    M = M.at[jnp.arange(out), lo].add(w_lo)
    M = M.at[jnp.arange(out), hi].add(w_hi)
    return M


# ------------------------------- forward ------------------------------------

def simplify_net_forward(x_nchw, p):
    x = jnp.transpose(x_nchw, (0, 2, 3, 1)).astype(jnp.float32)   # NHWC

    x1 = conv_bn_relu(x,  p['conv1_w'], p['bn1_g'], p['bn1_b'], 2, 1)
    x2 = conv_bn_relu(x1, p['conv2_w'], p['bn2_g'], p['bn2_b'], 2, 1)
    x3 = conv_bn_relu(x2, p['conv3_w'], p['bn3_g'], p['bn3_b'], 2, 1)

    u1 = convtranspose_bn_relu(x3, p['up1_w'], p['bn4_g'], p['bn4_b'], 2, 1)
    # TODO(synk): the channel concats could be avoided by K-splitting the next
    # layer's matmul (two accumulating dots inside one kernel); XLA glue here.
    up1 = jnp.concatenate([x2, u1], axis=-1)

    u2 = convtranspose_bn_relu(up1, p['up2_w'], p['bn5_g'], p['bn5_b'], 2, 1)
    up2 = jnp.concatenate([x1, u2], axis=-1)

    # 1x1 conv (no BN / ReLU), lane-dense transposed layout
    N, H, W, C = up2.shape
    at = jnp.transpose(up2, (3, 0, 1, 2)).reshape(C, N * H * W)
    wt = conv_weight_matrix_T(p['last_w'])                        # (nc, C)
    nc = wt.shape[0]
    o = pallas_matmul_bias_t(wt, at, p['last_b'])                 # (nc, N*H*W)

    # separable bilinear x2 upsample (align_corners=False)
    x_up = jnp.transpose(o.reshape(nc, N, H, W), (1, 0, 2, 3)).reshape(
        N * nc, H, W)
    up = pallas_bilinear_x2(x_up)                                 # (N*nc,2H,2W)
    return up.reshape(N, nc, 2 * H, 2 * W)                        # NCHW out


# ------------------------------ parameters -----------------------------------

def init_params(key, num_classes=2):
    ks = jax.random.split(key, 12)

    def conv_init(k, shape):
        fan_in = shape[1] * shape[2] * shape[3]
        bound = 1.0 / jnp.sqrt(fan_in)
        kw_, kb_ = jax.random.split(k)
        w = jax.random.uniform(kw_, shape, jnp.float32, -bound, bound)
        b = jax.random.uniform(kb_, (shape[0],), jnp.float32, -bound, bound)
        return w, b

    def convt_init(k, shape):  # (Cin, Cout, kh, kw)
        fan_in = shape[1] * shape[2] * shape[3]
        bound = 1.0 / jnp.sqrt(fan_in)
        kw_, kb_ = jax.random.split(k)
        w = jax.random.uniform(kw_, shape, jnp.float32, -bound, bound)
        b = jax.random.uniform(kb_, (shape[1],), jnp.float32, -bound, bound)
        return w, b

    p = {}
    p['conv1_w'], p['conv1_b'] = conv_init(ks[0], (16, 3, 3, 3))
    p['conv2_w'], p['conv2_b'] = conv_init(ks[1], (16, 16, 3, 3))
    p['conv3_w'], p['conv3_b'] = conv_init(ks[2], (16, 16, 3, 3))
    p['up1_w'],  p['up1_b'] = convt_init(ks[3], (16, 16, 4, 4))
    p['up2_w'],  p['up2_b'] = convt_init(ks[4], (32, 16, 4, 4))
    p['last_w'], p['last_b'] = conv_init(ks[5], (num_classes, 32, 1, 1))
    for i in range(1, 6):   # BatchNorm affine params (PyTorch init: 1 / 0)
        p[f'bn{i}_g'] = jnp.ones((16,), jnp.float32)
        p[f'bn{i}_b'] = jnp.zeros((16,), jnp.float32)
    return p


if __name__ == "__main__":
    key = jax.random.PRNGKey(0)
    kx, kp = jax.random.split(key)
    x = jax.random.normal(kx, (2, 3, 16, 16), jnp.float32)   # NCHW like PyTorch
    params = init_params(kp, num_classes=2)

    fwd = jax.jit(simplify_net_forward)
    out = fwd(x, params)
    jax.block_until_ready(out)

    assert out.shape == (2, 2, 16, 16), out.shape
    assert jnp.all(jnp.isfinite(out))
    print("KERNEL_OK")
</pallas_src>

<mosaic_0001>
module attributes {stable_mosaic.version = 11 : i64} {
  func.func private @main(%arg0: i32) attributes {dimension_semantics = [#tpu.dimension_semantics<core_parallel>], iteration_bounds = array<i64: 2>, tpu.core_type = #tpu.core_type<sc_scalar_subcore>, window_params = []} {
    return
  }
}

module attributes {stable_mosaic.version = 11 : i64} {
  func.func private @main(%arg0: i32) attributes {dimension_semantics = [#tpu.dimension_semantics<core_parallel>], iteration_bounds = array<i64: 2>, tpu.core_type = #tpu.core_type<sc_scalar_subcore>, window_params = []} {
    return
  }
}

module attributes {stable_mosaic.version = 11 : i64} {
  func.func @_matmul_bn_relu_t_fused_kernel(%arg0: i32, %arg1: memref<16x27xf32, #tpu.memory_space<vmem>>, %arg2: memref<27x128xf32, #tpu.memory_space<vmem>>, %arg3: memref<16x1xf32, #tpu.memory_space<vmem>>, %arg4: memref<16x1xf32, #tpu.memory_space<vmem>>, %arg5: memref<16x128xf32, #tpu.memory_space<vmem>>) attributes {dimension_semantics = [#tpu.dimension_semantics<arbitrary>], iteration_bounds = array<i64: 1>, scalar_prefetch = 0 : i64, scratch_operands = 0 : i64, tpu.core_type = #tpu.core_type<tc>, window_params = [{pipeline_mode = #tpu.pipeline_mode<synchronous>, transform_indices = @transform_0, window_bounds = array<i64: 16, 27>}, {pipeline_mode = #tpu.pipeline_mode<synchronous>, transform_indices = @transform_1, window_bounds = array<i64: 27, 128>}, {pipeline_mode = #tpu.pipeline_mode<synchronous>, transform_indices = @transform_2, window_bounds = array<i64: 16, 1>}, {pipeline_mode = #tpu.pipeline_mode<synchronous>, transform_indices = @transform_3, window_bounds = array<i64: 16, 1>}, {pipeline_mode = #tpu.pipeline_mode<synchronous>, transform_indices = @transform_4, window_bounds = array<i64: 16, 128>}]} {
    %c0 = arith.constant 0 : index
    %c0_0 = arith.constant 0 : index
    %0 = vector.load %arg1[%c0, %c0_0] : memref<16x27xf32, #tpu.memory_space<vmem>>, vector<16x27xf32>
    %c0_1 = arith.constant 0 : index
    %c0_2 = arith.constant 0 : index
    %1 = vector.load %arg2[%c0_1, %c0_2] : memref<27x128xf32, #tpu.memory_space<vmem>>, vector<27x128xf32>
    %cst = arith.constant dense<0.000000e+00> : vector<16x128xf32>
    %2 = tpu.matmul %0, %1, %cst {dimension_numbers = #tpu.dot_dimension_numbers<[1], [0], [0], [1], [0, 0, 1, 1], [], []>} : vector<16x27xf32>, vector<27x128xf32>, vector<16x128xf32> -> vector<16x128xf32>
    %cst_3 = arith.constant dense<0.000000e+00> : vector<16xf32>
    %3 = vector.multi_reduction <add>, %2, %cst_3 [1] : vector<16x128xf32> to vector<16xf32>
    %4 = vector.shape_cast %3 : vector<16xf32> to vector<16x1xf32>
    %cst_4 = arith.constant 1.280000e+02 : f32
    %5 = vector.broadcast %cst_4 : f32 to vector<16x1xf32>
    %6 = arith.divf %4, %5 : vector<16x1xf32>
    %7 = arith.mulf %2, %2 : vector<16x128xf32>
    %cst_5 = arith.constant dense<0.000000e+00> : vector<16xf32>
    %8 = vector.multi_reduction <add>, %7, %cst_5 [1] : vector<16x128xf32> to vector<16xf32>
    %9 = vector.shape_cast %8 : vector<16xf32> to vector<16x1xf32>
    %cst_6 = arith.constant 1.280000e+02 : f32
    %10 = vector.broadcast %cst_6 : f32 to vector<16x1xf32>
    %11 = arith.divf %9, %10 : vector<16x1xf32>
    %12 = arith.mulf %6, %6 : vector<16x1xf32>
    %13 = arith.subf %11, %12 : vector<16x1xf32>
    %c0_7 = arith.constant 0 : index
    %c0_8 = arith.constant 0 : index
    %14 = vector.load %arg3[%c0_7, %c0_8] : memref<16x1xf32, #tpu.memory_space<vmem>>, vector<16x1xf32>
    %cst_9 = arith.constant 9.99999974E-6 : f32
    %15 = vector.broadcast %cst_9 : f32 to vector<16x1xf32>
    %16 = arith.addf %13, %15 : vector<16x1xf32>
    %17 = math.rsqrt %16 : vector<16x1xf32>
    %18 = arith.mulf %14, %17 : vector<16x1xf32>
    %c0_10 = arith.constant 0 : index
    %c0_11 = arith.constant 0 : index
    %19 = vector.load %arg4[%c0_10, %c0_11] : memref<16x1xf32, #tpu.memory_space<vmem>>, vector<16x1xf32>
    %20 = arith.mulf %6, %18 : vector<16x1xf32>
    %21 = arith.subf %19, %20 : vector<16x1xf32>
    %22 = vector.broadcast %18 : vector<16x1xf32> to vector<16x128xf32>
    %23 = arith.mulf %2, %22 : vector<16x128xf32>
    %24 = vector.broadcast %21 : vector<16x1xf32> to vector<16x128xf32>
    %25 = arith.addf %23, %24 : vector<16x128xf32>
    %cst_12 = arith.constant 0.000000e+00 : f32
    %26 = vector.broadcast %cst_12 : f32 to vector<16x128xf32>
    %27 = arith.maximumf %25, %26 : vector<16x128xf32>
    %c0_13 = arith.constant 0 : index
    %c0_14 = arith.constant 0 : index
    %28 = vector.load %arg5[%c0_13, %c0_14] : memref<16x128xf32, #tpu.memory_space<vmem>>, vector<16x128xf32>
    tpu.vector_store %arg5[%c0_13, %c0_14], %27 {strides = array<i32>} : memref<16x128xf32, #tpu.memory_space<vmem>>, vector<16x128xf32>,
    return
  }
  func.func @transform_0(%arg0: i32) -> (i32, i32) {
    %c0_i32 = arith.constant 0 : i32
    %c0_i32_0 = arith.constant 0 : i32
    %c0_i32_1 = arith.constant 0 : i32
    return %c0_i32, %c0_i32_0 : i32, i32
  }
  func.func @transform_1(%arg0: i32) -> (i32, i32) {
    %c0_i32 = arith.constant 0 : i32
    %c0_i32_0 = arith.constant 0 : i32
    %c0_i32_1 = arith.constant 0 : i32
    return %c0_i32, %c0_i32_0 : i32, i32
  }
  func.func @transform_2(%arg0: i32) -> (i32, i32) {
    %c0_i32 = arith.constant 0 : i32
    %c0_i32_0 = arith.constant 0 : i32
    %c0_i32_1 = arith.constant 0 : i32
    return %c0_i32, %c0_i32_0 : i32, i32
  }
  func.func @transform_3(%arg0: i32) -> (i32, i32) {
    %c0_i32 = arith.constant 0 : i32
    %c0_i32_0 = arith.constant 0 : i32
    %c0_i32_1 = arith.constant 0 : i32
    return %c0_i32, %c0_i32_0 : i32, i32
  }
  func.func @transform_4(%arg0: i32) -> (i32, i32) {
    %c0_i32 = arith.constant 0 : i32
    %c0_i32_0 = arith.constant 0 : i32
    %c0_i32_1 = arith.constant 0 : i32
    return %c0_i32, %c0_i32_0 : i32, i32
  }
}

module attributes {stable_mosaic.version = 11 : i64} {
  func.func @_matmul_bn_relu_t_fused_kernel(%arg0: i32, %arg1: memref<16x144xf32, #tpu.memory_space<vmem>>, %arg2: memref<144x32xf32, #tpu.memory_space<vmem>>, %arg3: memref<16x1xf32, #tpu.memory_space<vmem>>, %arg4: memref<16x1xf32, #tpu.memory_space<vmem>>, %arg5: memref<16x32xf32, #tpu.memory_space<vmem>>) attributes {dimension_semantics = [#tpu.dimension_semantics<arbitrary>], iteration_bounds = array<i64: 1>, scalar_prefetch = 0 : i64, scratch_operands = 0 : i64, tpu.core_type = #tpu.core_type<tc>, window_params = [{pipeline_mode = #tpu.pipeline_mode<synchronous>, transform_indices = @transform_0, window_bounds = array<i64: 16, 144>}, {pipeline_mode = #tpu.pipeline_mode<synchronous>, transform_indices = @transform_1, window_bounds = array<i64: 144, 32>}, {pipeline_mode = #tpu.pipeline_mode<synchronous>, transform_indices = @transform_2, window_bounds = array<i64: 16, 1>}, {pipeline_mode = #tpu.pipeline_mode<synchronous>, transform_indices = @transform_3, window_bounds = array<i64: 16, 1>}, {pipeline_mode = #tpu.pipeline_mode<synchronous>, transform_indices = @transform_4, window_bounds = array<i64: 16, 32>}]} {
    %c0 = arith.constant 0 : index
    %c0_0 = arith.constant 0 : index
    %0 = vector.load %arg1[%c0, %c0_0] : memref<16x144xf32, #tpu.memory_space<vmem>>, vector<16x144xf32>
    %c0_1 = arith.constant 0 : index
    %c0_2 = arith.constant 0 : index
    %1 = vector.load %arg2[%c0_1, %c0_2] : memref<144x32xf32, #tpu.memory_space<vmem>>, vector<144x32xf32>
    %cst = arith.constant dense<0.000000e+00> : vector<16x32xf32>
    %2 = tpu.matmul %0, %1, %cst {dimension_numbers = #tpu.dot_dimension_numbers<[1], [0], [0], [1], [0, 0, 1, 1], [], []>} : vector<16x144xf32>, vector<144x32xf32>, vector<16x32xf32> -> vector<16x32xf32>
    %cst_3 = arith.constant dense<0.000000e+00> : vector<16xf32>
    %3 = vector.multi_reduction <add>, %2, %cst_3 [1] : vector<16x32xf32> to vector<16xf32>
    %4 = vector.shape_cast %3 : vector<16xf32> to vector<16x1xf32>
    %cst_4 = arith.constant 3.200000e+01 : f32
    %5 = vector.broadcast %cst_4 : f32 to vector<16x1xf32>
    %6 = arith.divf %4, %5 : vector<16x1xf32>
    %7 = arith.mulf %2, %2 : vector<16x32xf32>
    %cst_5 = arith.constant dense<0.000000e+00> : vector<16xf32>
    %8 = vector.multi_reduction <add>, %7, %cst_5 [1] : vector<16x32xf32> to vector<16xf32>
    %9 = vector.shape_cast %8 : vector<16xf32> to vector<16x1xf32>
    %cst_6 = arith.constant 3.200000e+01 : f32
    %10 = vector.broadcast %cst_6 : f32 to vector<16x1xf32>
    %11 = arith.divf %9, %10 : vector<16x1xf32>
    %12 = arith.mulf %6, %6 : vector<16x1xf32>
    %13 = arith.subf %11, %12 : vector<16x1xf32>
    %c0_7 = arith.constant 0 : index
    %c0_8 = arith.constant 0 : index
    %14 = vector.load %arg3[%c0_7, %c0_8] : memref<16x1xf32, #tpu.memory_space<vmem>>, vector<16x1xf32>
    %cst_9 = arith.constant 9.99999974E-6 : f32
    %15 = vector.broadcast %cst_9 : f32 to vector<16x1xf32>
    %16 = arith.addf %13, %15 : vector<16x1xf32>
    %17 = math.rsqrt %16 : vector<16x1xf32>
    %18 = arith.mulf %14, %17 : vector<16x1xf32>
    %c0_10 = arith.constant 0 : index
    %c0_11 = arith.constant 0 : index
    %19 = vector.load %arg4[%c0_10, %c0_11] : memref<16x1xf32, #tpu.memory_space<vmem>>, vector<16x1xf32>
    %20 = arith.mulf %6, %18 : vector<16x1xf32>
    %21 = arith.subf %19, %20 : vector<16x1xf32>
    %22 = vector.broadcast %18 : vector<16x1xf32> to vector<16x32xf32>
    %23 = arith.mulf %2, %22 : vector<16x32xf32>
    %24 = vector.broadcast %21 : vector<16x1xf32> to vector<16x32xf32>
    %25 = arith.addf %23, %24 : vector<16x32xf32>
    %cst_12 = arith.constant 0.000000e+00 : f32
    %26 = vector.broadcast %cst_12 : f32 to vector<16x32xf32>
    %27 = arith.maximumf %25, %26 : vector<16x32xf32>
    %c0_13 = arith.constant 0 : index
    %c0_14 = arith.constant 0 : index
    %28 = vector.load %arg5[%c0_13, %c0_14] : memref<16x32xf32, #tpu.memory_space<vmem>>, vector<16x32xf32>
    tpu.vector_store %arg5[%c0_13, %c0_14], %27 {strides = array<i32>} : memref<16x32xf32, #tpu.memory_space<vmem>>, vector<16x32xf32>,
    return
  }
  func.func @transform_0(%arg0: i32) -> (i32, i32) {
    %c0_i32 = arith.constant 0 : i32
    %c0_i32_0 = arith.constant 0 : i32
    %c0_i32_1 = arith.constant 0 : i32
    return %c0_i32, %c0_i32_0 : i32, i32
  }
  func.func @transform_1(%arg0: i32) -> (i32, i32) {
    %c0_i32 = arith.constant 0 : i32
    %c0_i32_0 = arith.constant 0 : i32
    %c0_i32_1 = arith.constant 0 : i32
    return %c0_i32, %c0_i32_0 : i32, i32
  }
  func.func @transform_2(%arg0: i32) -> (i32, i32) {
    %c0_i32 = arith.constant 0 : i32
    %c0_i32_0 = arith.constant 0 : i32
    %c0_i32_1 = arith.constant 0 : i32
    return %c0_i32, %c0_i32_0 : i32, i32
  }
  func.func @transform_3(%arg0: i32) -> (i32, i32) {
    %c0_i32 = arith.constant 0 : i32
    %c0_i32_0 = arith.constant 0 : i32
    %c0_i32_1 = arith.constant 0 : i32
    return %c0_i32, %c0_i32_0 : i32, i32
  }
  func.func @transform_4(%arg0: i32) -> (i32, i32) {
    %c0_i32 = arith.constant 0 : i32
    %c0_i32_0 = arith.constant 0 : i32
    %c0_i32_1 = arith.constant 0 : i32
    return %c0_i32, %c0_i32_0 : i32, i32
  }
}

module attributes {stable_mosaic.version = 11 : i64} {
  func.func @_matmul_bn_relu_t_fused_kernel(%arg0: i32, %arg1: memref<16x144xf32, #tpu.memory_space<vmem>>, %arg2: memref<144x8xf32, #tpu.memory_space<vmem>>, %arg3: memref<16x1xf32, #tpu.memory_space<vmem>>, %arg4: memref<16x1xf32, #tpu.memory_space<vmem>>, %arg5: memref<16x8xf32, #tpu.memory_space<vmem>>) attributes {dimension_semantics = [#tpu.dimension_semantics<arbitrary>], iteration_bounds = array<i64: 1>, scalar_prefetch = 0 : i64, scratch_operands = 0 : i64, tpu.core_type = #tpu.core_type<tc>, window_params = [{pipeline_mode = #tpu.pipeline_mode<synchronous>, transform_indices = @transform_0, window_bounds = array<i64: 16, 144>}, {pipeline_mode = #tpu.pipeline_mode<synchronous>, transform_indices = @transform_1, window_bounds = array<i64: 144, 8>}, {pipeline_mode = #tpu.pipeline_mode<synchronous>, transform_indices = @transform_2, window_bounds = array<i64: 16, 1>}, {pipeline_mode = #tpu.pipeline_mode<synchronous>, transform_indices = @transform_3, window_bounds = array<i64: 16, 1>}, {pipeline_mode = #tpu.pipeline_mode<synchronous>, transform_indices = @transform_4, window_bounds = array<i64: 16, 8>}]} {
    %c0 = arith.constant 0 : index
    %c0_0 = arith.constant 0 : index
    %0 = vector.load %arg1[%c0, %c0_0] : memref<16x144xf32, #tpu.memory_space<vmem>>, vector<16x144xf32>
    %c0_1 = arith.constant 0 : index
    %c0_2 = arith.constant 0 : index
    %1 = vector.load %arg2[%c0_1, %c0_2] : memref<144x8xf32, #tpu.memory_space<vmem>>, vector<144x8xf32>
    %cst = arith.constant dense<0.000000e+00> : vector<16x8xf32>
    %2 = tpu.matmul %0, %1, %cst {dimension_numbers = #tpu.dot_dimension_numbers<[1], [0], [0], [1], [0, 0, 1, 1], [], []>} : vector<16x144xf32>, vector<144x8xf32>, vector<16x8xf32> -> vector<16x8xf32>
    %cst_3 = arith.constant dense<0.000000e+00> : vector<16xf32>
    %3 = vector.multi_reduction <add>, %2, %cst_3 [1] : vector<16x8xf32> to vector<16xf32>
    %4 = vector.shape_cast %3 : vector<16xf32> to vector<16x1xf32>
    %cst_4 = arith.constant 8.000000e+00 : f32
    %5 = vector.broadcast %cst_4 : f32 to vector<16x1xf32>
    %6 = arith.divf %4, %5 : vector<16x1xf32>
    %7 = arith.mulf %2, %2 : vector<16x8xf32>
    %cst_5 = arith.constant dense<0.000000e+00> : vector<16xf32>
    %8 = vector.multi_reduction <add>, %7, %cst_5 [1] : vector<16x8xf32> to vector<16xf32>
    %9 = vector.shape_cast %8 : vector<16xf32> to vector<16x1xf32>
    %cst_6 = arith.constant 8.000000e+00 : f32
    %10 = vector.broadcast %cst_6 : f32 to vector<16x1xf32>
    %11 = arith.divf %9, %10 : vector<16x1xf32>
    %12 = arith.mulf %6, %6 : vector<16x1xf32>
    %13 = arith.subf %11, %12 : vector<16x1xf32>
    %c0_7 = arith.constant 0 : index
    %c0_8 = arith.constant 0 : index
    %14 = vector.load %arg3[%c0_7, %c0_8] : memref<16x1xf32, #tpu.memory_space<vmem>>, vector<16x1xf32>
    %cst_9 = arith.constant 9.99999974E-6 : f32
    %15 = vector.broadcast %cst_9 : f32 to vector<16x1xf32>
    %16 = arith.addf %13, %15 : vector<16x1xf32>
    %17 = math.rsqrt %16 : vector<16x1xf32>
    %18 = arith.mulf %14, %17 : vector<16x1xf32>
    %c0_10 = arith.constant 0 : index
    %c0_11 = arith.constant 0 : index
    %19 = vector.load %arg4[%c0_10, %c0_11] : memref<16x1xf32, #tpu.memory_space<vmem>>, vector<16x1xf32>
    %20 = arith.mulf %6, %18 : vector<16x1xf32>
    %21 = arith.subf %19, %20 : vector<16x1xf32>
    %22 = vector.broadcast %18 : vector<16x1xf32> to vector<16x8xf32>
    %23 = arith.mulf %2, %22 : vector<16x8xf32>
    %24 = vector.broadcast %21 : vector<16x1xf32> to vector<16x8xf32>
    %25 = arith.addf %23, %24 : vector<16x8xf32>
    %cst_12 = arith.constant 0.000000e+00 : f32
    %26 = vector.broadcast %cst_12 : f32 to vector<16x8xf32>
    %27 = arith.maximumf %25, %26 : vector<16x8xf32>
    %c0_13 = arith.constant 0 : index
    %c0_14 = arith.constant 0 : index
    %28 = vector.load %arg5[%c0_13, %c0_14] : memref<16x8xf32, #tpu.memory_space<vmem>>, vector<16x8xf32>
    tpu.vector_store %arg5[%c0_13, %c0_14], %27 {strides = array<i32>} : memref<16x8xf32, #tpu.memory_space<vmem>>, vector<16x8xf32>,
    return
  }
  func.func @transform_0(%arg0: i32) -> (i32, i32) {
    %c0_i32 = arith.constant 0 : i32
    %c0_i32_0 = arith.constant 0 : i32
    %c0_i32_1 = arith.constant 0 : i32
    return %c0_i32, %c0_i32_0 : i32, i32
  }
  func.func @transform_1(%arg0: i32) -> (i32, i32) {
    %c0_i32 = arith.constant 0 : i32
    %c0_i32_0 = arith.constant 0 : i32
    %c0_i32_1 = arith.constant 0 : i32
    return %c0_i32, %c0_i32_0 : i32, i32
  }
  func.func @transform_2(%arg0: i32) -> (i32, i32) {
    %c0_i32 = arith.constant 0 : i32
    %c0_i32_0 = arith.constant 0 : i32
    %c0_i32_1 = arith.constant 0 : i32
    return %c0_i32, %c0_i32_0 : i32, i32
  }
  func.func @transform_3(%arg0: i32) -> (i32, i32) {
    %c0_i32 = arith.constant 0 : i32
    %c0_i32_0 = arith.constant 0 : i32
    %c0_i32_1 = arith.constant 0 : i32
    return %c0_i32, %c0_i32_0 : i32, i32
  }
  func.func @transform_4(%arg0: i32) -> (i32, i32) {
    %c0_i32 = arith.constant 0 : i32
    %c0_i32_0 = arith.constant 0 : i32
    %c0_i32_1 = arith.constant 0 : i32
    return %c0_i32, %c0_i32_0 : i32, i32
  }
}

module attributes {stable_mosaic.version = 11 : i64} {
  func.func @_matmul_bn_relu_t_fused_kernel(%arg0: i32, %arg1: memref<16x256xf32, #tpu.memory_space<vmem>>, %arg2: memref<256x32xf32, #tpu.memory_space<vmem>>, %arg3: memref<16x1xf32, #tpu.memory_space<vmem>>, %arg4: memref<16x1xf32, #tpu.memory_space<vmem>>, %arg5: memref<16x32xf32, #tpu.memory_space<vmem>>) attributes {dimension_semantics = [#tpu.dimension_semantics<arbitrary>], iteration_bounds = array<i64: 1>, scalar_prefetch = 0 : i64, scratch_operands = 0 : i64, tpu.core_type = #tpu.core_type<tc>, window_params = [{pipeline_mode = #tpu.pipeline_mode<synchronous>, transform_indices = @transform_0, window_bounds = array<i64: 16, 256>}, {pipeline_mode = #tpu.pipeline_mode<synchronous>, transform_indices = @transform_1, window_bounds = array<i64: 256, 32>}, {pipeline_mode = #tpu.pipeline_mode<synchronous>, transform_indices = @transform_2, window_bounds = array<i64: 16, 1>}, {pipeline_mode = #tpu.pipeline_mode<synchronous>, transform_indices = @transform_3, window_bounds = array<i64: 16, 1>}, {pipeline_mode = #tpu.pipeline_mode<synchronous>, transform_indices = @transform_4, window_bounds = array<i64: 16, 32>}]} {
    %c0 = arith.constant 0 : index
    %c0_0 = arith.constant 0 : index
    %0 = vector.load %arg1[%c0, %c0_0] : memref<16x256xf32, #tpu.memory_space<vmem>>, vector<16x256xf32>
    %c0_1 = arith.constant 0 : index
    %c0_2 = arith.constant 0 : index
    %1 = vector.load %arg2[%c0_1, %c0_2] : memref<256x32xf32, #tpu.memory_space<vmem>>, vector<256x32xf32>
    %cst = arith.constant dense<0.000000e+00> : vector<16x32xf32>
    %2 = tpu.matmul %0, %1, %cst {dimension_numbers = #tpu.dot_dimension_numbers<[1], [0], [0], [1], [0, 0, 1, 1], [], []>} : vector<16x256xf32>, vector<256x32xf32>, vector<16x32xf32> -> vector<16x32xf32>
    %cst_3 = arith.constant dense<0.000000e+00> : vector<16xf32>
    %3 = vector.multi_reduction <add>, %2, %cst_3 [1] : vector<16x32xf32> to vector<16xf32>
    %4 = vector.shape_cast %3 : vector<16xf32> to vector<16x1xf32>
    %cst_4 = arith.constant 3.200000e+01 : f32
    %5 = vector.broadcast %cst_4 : f32 to vector<16x1xf32>
    %6 = arith.divf %4, %5 : vector<16x1xf32>
    %7 = arith.mulf %2, %2 : vector<16x32xf32>
    %cst_5 = arith.constant dense<0.000000e+00> : vector<16xf32>
    %8 = vector.multi_reduction <add>, %7, %cst_5 [1] : vector<16x32xf32> to vector<16xf32>
    %9 = vector.shape_cast %8 : vector<16xf32> to vector<16x1xf32>
    %cst_6 = arith.constant 3.200000e+01 : f32
    %10 = vector.broadcast %cst_6 : f32 to vector<16x1xf32>
    %11 = arith.divf %9, %10 : vector<16x1xf32>
    %12 = arith.mulf %6, %6 : vector<16x1xf32>
    %13 = arith.subf %11, %12 : vector<16x1xf32>
    %c0_7 = arith.constant 0 : index
    %c0_8 = arith.constant 0 : index
    %14 = vector.load %arg3[%c0_7, %c0_8] : memref<16x1xf32, #tpu.memory_space<vmem>>, vector<16x1xf32>
    %cst_9 = arith.constant 9.99999974E-6 : f32
    %15 = vector.broadcast %cst_9 : f32 to vector<16x1xf32>
    %16 = arith.addf %13, %15 : vector<16x1xf32>
    %17 = math.rsqrt %16 : vector<16x1xf32>
    %18 = arith.mulf %14, %17 : vector<16x1xf32>
    %c0_10 = arith.constant 0 : index
    %c0_11 = arith.constant 0 : index
    %19 = vector.load %arg4[%c0_10, %c0_11] : memref<16x1xf32, #tpu.memory_space<vmem>>, vector<16x1xf32>
    %20 = arith.mulf %6, %18 : vector<16x1xf32>
    %21 = arith.subf %19, %20 : vector<16x1xf32>
    %22 = vector.broadcast %18 : vector<16x1xf32> to vector<16x32xf32>
    %23 = arith.mulf %2, %22 : vector<16x32xf32>
    %24 = vector.broadcast %21 : vector<16x1xf32> to vector<16x32xf32>
    %25 = arith.addf %23, %24 : vector<16x32xf32>
    %cst_12 = arith.constant 0.000000e+00 : f32
    %26 = vector.broadcast %cst_12 : f32 to vector<16x32xf32>
    %27 = arith.maximumf %25, %26 : vector<16x32xf32>
    %c0_13 = arith.constant 0 : index
    %c0_14 = arith.constant 0 : index
    %28 = vector.load %arg5[%c0_13, %c0_14] : memref<16x32xf32, #tpu.memory_space<vmem>>, vector<16x32xf32>
    tpu.vector_store %arg5[%c0_13, %c0_14], %27 {strides = array<i32>} : memref<16x32xf32, #tpu.memory_space<vmem>>, vector<16x32xf32>,
    return
  }
  func.func @transform_0(%arg0: i32) -> (i32, i32) {
    %c0_i32 = arith.constant 0 : i32
    %c0_i32_0 = arith.constant 0 : i32
    %c0_i32_1 = arith.constant 0 : i32
    return %c0_i32, %c0_i32_0 : i32, i32
  }
  func.func @transform_1(%arg0: i32) -> (i32, i32) {
    %c0_i32 = arith.constant 0 : i32
    %c0_i32_0 = arith.constant 0 : i32
    %c0_i32_1 = arith.constant 0 : i32
    return %c0_i32, %c0_i32_0 : i32, i32
  }
  func.func @transform_2(%arg0: i32) -> (i32, i32) {
    %c0_i32 = arith.constant 0 : i32
    %c0_i32_0 = arith.constant 0 : i32
    %c0_i32_1 = arith.constant 0 : i32
    return %c0_i32, %c0_i32_0 : i32, i32
  }
  func.func @transform_3(%arg0: i32) -> (i32, i32) {
    %c0_i32 = arith.constant 0 : i32
    %c0_i32_0 = arith.constant 0 : i32
    %c0_i32_1 = arith.constant 0 : i32
    return %c0_i32, %c0_i32_0 : i32, i32
  }
  func.func @transform_4(%arg0: i32) -> (i32, i32) {
    %c0_i32 = arith.constant 0 : i32
    %c0_i32_0 = arith.constant 0 : i32
    %c0_i32_1 = arith.constant 0 : i32
    return %c0_i32, %c0_i32_0 : i32, i32
  }
}

module attributes {stable_mosaic.version = 11 : i64} {
  func.func @_matmul_bn_relu_t_fused_kernel(%arg0: i32, %arg1: memref<16x512xf32, #tpu.memory_space<vmem>>, %arg2: memref<512x128xf32, #tpu.memory_space<vmem>>, %arg3: memref<16x1xf32, #tpu.memory_space<vmem>>, %arg4: memref<16x1xf32, #tpu.memory_space<vmem>>, %arg5: memref<16x128xf32, #tpu.memory_space<vmem>>) attributes {dimension_semantics = [#tpu.dimension_semantics<arbitrary>], iteration_bounds = array<i64: 1>, scalar_prefetch = 0 : i64, scratch_operands = 0 : i64, tpu.core_type = #tpu.core_type<tc>, window_params = [{pipeline_mode = #tpu.pipeline_mode<synchronous>, transform_indices = @transform_0, window_bounds = array<i64: 16, 512>}, {pipeline_mode = #tpu.pipeline_mode<synchronous>, transform_indices = @transform_1, window_bounds = array<i64: 512, 128>}, {pipeline_mode = #tpu.pipeline_mode<synchronous>, transform_indices = @transform_2, window_bounds = array<i64: 16, 1>}, {pipeline_mode = #tpu.pipeline_mode<synchronous>, transform_indices = @transform_3, window_bounds = array<i64: 16, 1>}, {pipeline_mode = #tpu.pipeline_mode<synchronous>, transform_indices = @transform_4, window_bounds = array<i64: 16, 128>}]} {
    %c0 = arith.constant 0 : index
    %c0_0 = arith.constant 0 : index
    %0 = vector.load %arg1[%c0, %c0_0] : memref<16x512xf32, #tpu.memory_space<vmem>>, vector<16x512xf32>
    %c0_1 = arith.constant 0 : index
    %c0_2 = arith.constant 0 : index
    %1 = vector.load %arg2[%c0_1, %c0_2] : memref<512x128xf32, #tpu.memory_space<vmem>>, vector<512x128xf32>
    %cst = arith.constant dense<0.000000e+00> : vector<16x128xf32>
    %2 = tpu.matmul %0, %1, %cst {dimension_numbers = #tpu.dot_dimension_numbers<[1], [0], [0], [1], [0, 0, 1, 1], [], []>} : vector<16x512xf32>, vector<512x128xf32>, vector<16x128xf32> -> vector<16x128xf32>
    %cst_3 = arith.constant dense<0.000000e+00> : vector<16xf32>
    %3 = vector.multi_reduction <add>, %2, %cst_3 [1] : vector<16x128xf32> to vector<16xf32>
    %4 = vector.shape_cast %3 : vector<16xf32> to vector<16x1xf32>
    %cst_4 = arith.constant 1.280000e+02 : f32
    %5 = vector.broadcast %cst_4 : f32 to vector<16x1xf32>
    %6 = arith.divf %4, %5 : vector<16x1xf32>
    %7 = arith.mulf %2, %2 : vector<16x128xf32>
    %cst_5 = arith.constant dense<0.000000e+00> : vector<16xf32>
    %8 = vector.multi_reduction <add>, %7, %cst_5 [1] : vector<16x128xf32> to vector<16xf32>
    %9 = vector.shape_cast %8 : vector<16xf32> to vector<16x1xf32>
    %cst_6 = arith.constant 1.280000e+02 : f32
    %10 = vector.broadcast %cst_6 : f32 to vector<16x1xf32>
    %11 = arith.divf %9, %10 : vector<16x1xf32>
    %12 = arith.mulf %6, %6 : vector<16x1xf32>
    %13 = arith.subf %11, %12 : vector<16x1xf32>
    %c0_7 = arith.constant 0 : index
    %c0_8 = arith.constant 0 : index
    %14 = vector.load %arg3[%c0_7, %c0_8] : memref<16x1xf32, #tpu.memory_space<vmem>>, vector<16x1xf32>
    %cst_9 = arith.constant 9.99999974E-6 : f32
    %15 = vector.broadcast %cst_9 : f32 to vector<16x1xf32>
    %16 = arith.addf %13, %15 : vector<16x1xf32>
    %17 = math.rsqrt %16 : vector<16x1xf32>
    %18 = arith.mulf %14, %17 : vector<16x1xf32>
    %c0_10 = arith.constant 0 : index
    %c0_11 = arith.constant 0 : index
    %19 = vector.load %arg4[%c0_10, %c0_11] : memref<16x1xf32, #tpu.memory_space<vmem>>, vector<16x1xf32>
    %20 = arith.mulf %6, %18 : vector<16x1xf32>
    %21 = arith.subf %19, %20 : vector<16x1xf32>
    %22 = vector.broadcast %18 : vector<16x1xf32> to vector<16x128xf32>
    %23 = arith.mulf %2, %22 : vector<16x128xf32>
    %24 = vector.broadcast %21 : vector<16x1xf32> to vector<16x128xf32>
    %25 = arith.addf %23, %24 : vector<16x128xf32>
    %cst_12 = arith.constant 0.000000e+00 : f32
    %26 = vector.broadcast %cst_12 : f32 to vector<16x128xf32>
    %27 = arith.maximumf %25, %26 : vector<16x128xf32>
    %c0_13 = arith.constant 0 : index
    %c0_14 = arith.constant 0 : index
    %28 = vector.load %arg5[%c0_13, %c0_14] : memref<16x128xf32, #tpu.memory_space<vmem>>, vector<16x128xf32>
    tpu.vector_store %arg5[%c0_13, %c0_14], %27 {strides = array<i32>} : memref<16x128xf32, #tpu.memory_space<vmem>>, vector<16x128xf32>,
    return
  }
  func.func @transform_0(%arg0: i32) -> (i32, i32) {
    %c0_i32 = arith.constant 0 : i32
    %c0_i32_0 = arith.constant 0 : i32
    %c0_i32_1 = arith.constant 0 : i32
    return %c0_i32, %c0_i32_0 : i32, i32
  }
  func.func @transform_1(%arg0: i32) -> (i32, i32) {
    %c0_i32 = arith.constant 0 : i32
    %c0_i32_0 = arith.constant 0 : i32
    %c0_i32_1 = arith.constant 0 : i32
    return %c0_i32, %c0_i32_0 : i32, i32
  }
  func.func @transform_2(%arg0: i32) -> (i32, i32) {
    %c0_i32 = arith.constant 0 : i32
    %c0_i32_0 = arith.constant 0 : i32
    %c0_i32_1 = arith.constant 0 : i32
    return %c0_i32, %c0_i32_0 : i32, i32
  }
  func.func @transform_3(%arg0: i32) -> (i32, i32) {
    %c0_i32 = arith.constant 0 : i32
    %c0_i32_0 = arith.constant 0 : i32
    %c0_i32_1 = arith.constant 0 : i32
    return %c0_i32, %c0_i32_0 : i32, i32
  }
  func.func @transform_4(%arg0: i32) -> (i32, i32) {
    %c0_i32 = arith.constant 0 : i32
    %c0_i32_0 = arith.constant 0 : i32
    %c0_i32_1 = arith.constant 0 : i32
    return %c0_i32, %c0_i32_0 : i32, i32
  }
}

module attributes {stable_mosaic.version = 11 : i64} {
  func.func @_matmul_bias_t_kernel(%arg0: i32, %arg1: memref<2x32xf32, #tpu.memory_space<vmem>>, %arg2: memref<32x128xf32, #tpu.memory_space<vmem>>, %arg3: memref<2x1xf32, #tpu.memory_space<vmem>>, %arg4: memref<2x128xf32, #tpu.memory_space<vmem>>) attributes {dimension_semantics = [#tpu.dimension_semantics<parallel>], iteration_bounds = array<i64: 1>, scalar_prefetch = 0 : i64, scratch_operands = 0 : i64, tpu.core_type = #tpu.core_type<tc>, window_params = [{pipeline_mode = #tpu.pipeline_mode<synchronous>, transform_indices = @transform_0, window_bounds = array<i64: 2, 32>}, {transform_indices = @transform_1, window_bounds = array<i64: 32, 128>}, {pipeline_mode = #tpu.pipeline_mode<synchronous>, transform_indices = @transform_2, window_bounds = array<i64: 2, 1>}, {transform_indices = @transform_3, window_bounds = array<i64: 2, 128>}]} {
    %c0 = arith.constant 0 : index
    %c0_0 = arith.constant 0 : index
    %0 = vector.load %arg1[%c0, %c0_0] : memref<2x32xf32, #tpu.memory_space<vmem>>, vector<2x32xf32>
    %c0_1 = arith.constant 0 : index
    %c0_2 = arith.constant 0 : index
    %1 = vector.load %arg2[%c0_1, %c0_2] : memref<32x128xf32, #tpu.memory_space<vmem>>, vector<32x128xf32>
    %cst = arith.constant dense<0.000000e+00> : vector<2x128xf32>
    %2 = tpu.matmul %0, %1, %cst {dimension_numbers = #tpu.dot_dimension_numbers<[1], [0], [0], [1], [0, 0, 1, 1], [], []>} : vector<2x32xf32>, vector<32x128xf32>, vector<2x128xf32> -> vector<2x128xf32>
    %c0_3 = arith.constant 0 : index
    %c0_4 = arith.constant 0 : index
    %3 = vector.load %arg3[%c0_3, %c0_4] : memref<2x1xf32, #tpu.memory_space<vmem>>, vector<2x1xf32>
    %4 = vector.broadcast %3 : vector<2x1xf32> to vector<2x128xf32>
    %5 = arith.addf %2, %4 : vector<2x128xf32>
    %c0_5 = arith.constant 0 : index
    %c0_6 = arith.constant 0 : index
    %6 = vector.load %arg4[%c0_5, %c0_6] : memref<2x128xf32, #tpu.memory_space<vmem>>, vector<2x128xf32>
    tpu.vector_store %arg4[%c0_5, %c0_6], %5 {strides = array<i32>} : memref<2x128xf32, #tpu.memory_space<vmem>>, vector<2x128xf32>,
    return
  }
  func.func @transform_0(%arg0: i32) -> (i32, i32) {
    %c0_i32 = arith.constant 0 : i32
    %c0_i32_0 = arith.constant 0 : i32
    %c0_i32_1 = arith.constant 0 : i32
    return %c0_i32, %c0_i32_0 : i32, i32
  }
  func.func @transform_1(%arg0: i32) -> (i32, i32) {
    %c0_i32 = arith.constant 0 : i32
    %c0_i32_0 = arith.constant 0 : i32
    return %c0_i32, %arg0 : i32, i32
  }
  func.func @transform_2(%arg0: i32) -> (i32, i32) {
    %c0_i32 = arith.constant 0 : i32
    %c0_i32_0 = arith.constant 0 : i32
    %c0_i32_1 = arith.constant 0 : i32
    return %c0_i32, %c0_i32_0 : i32, i32
  }
  func.func @transform_3(%arg0: i32) -> (i32, i32) {
    %c0_i32 = arith.constant 0 : i32
    %c0_i32_0 = arith.constant 0 : i32
    return %c0_i32, %arg0 : i32, i32
  }
}

module attributes {stable_mosaic.version = 11 : i64} {
  func.func @_bilinear_x2_kernel(%arg0: i32, %arg1: memref<16x8xf32, #tpu.memory_space<vmem>>, %arg2: memref<8x16xf32, #tpu.memory_space<vmem>>, %arg3: memref<4x8x8xf32, #tpu.memory_space<vmem>>, %arg4: memref<4x16x16xf32, #tpu.memory_space<vmem>>) attributes {dimension_semantics = [#tpu.dimension_semantics<arbitrary>], iteration_bounds = array<i64: 1>, scalar_prefetch = 0 : i64, scratch_operands = 0 : i64, tpu.core_type = #tpu.core_type<tc>, window_params = [{pipeline_mode = #tpu.pipeline_mode<synchronous>, transform_indices = @transform_0, window_bounds = array<i64: 16, 8>}, {pipeline_mode = #tpu.pipeline_mode<synchronous>, transform_indices = @transform_1, window_bounds = array<i64: 8, 16>}, {pipeline_mode = #tpu.pipeline_mode<synchronous>, transform_indices = @transform_2, window_bounds = array<i64: 4, 8, 8>}, {pipeline_mode = #tpu.pipeline_mode<synchronous>, transform_indices = @transform_3, window_bounds = array<i64: 4, 16, 16>}]} {
    %c0 = arith.constant 0 : index
    %c0_0 = arith.constant 0 : index
    %0 = vector.load %arg1[%c0, %c0_0] : memref<16x8xf32, #tpu.memory_space<vmem>>, vector<16x8xf32>
    %c0_1 = arith.constant 0 : index
    %c0_2 = arith.constant 0 : index
    %1 = vector.load %arg2[%c0_1, %c0_2] : memref<8x16xf32, #tpu.memory_space<vmem>>, vector<8x16xf32>
    %c0_3 = arith.constant 0 : index
    %c0_4 = arith.constant 0 : index
    %c0_5 = arith.constant 0 : index
    %2 = vector.load %arg3[%c0_3, %c0_4, %c0_5] : memref<4x8x8xf32, #tpu.memory_space<vmem>>, vector<1x8x8xf32>
    %3 = vector.shape_cast %2 : vector<1x8x8xf32> to vector<8x8xf32>
    %cst = arith.constant dense<0.000000e+00> : vector<16x8xf32>
    %4 = tpu.matmul %0, %3, %cst {dimension_numbers = #tpu.dot_dimension_numbers<[1], [0], [0], [1], [0, 0, 1, 1], [], []>} : vector<16x8xf32>, vector<8x8xf32>, vector<16x8xf32> -> vector<16x8xf32>
    %cst_6 = arith.constant dense<0.000000e+00> : vector<16x16xf32>
    %5 = tpu.matmul %4, %1, %cst_6 {dimension_numbers = #tpu.dot_dimension_numbers<[1], [0], [0], [1], [0, 0, 1, 1], [], []>} : vector<16x8xf32>, vector<8x16xf32>, vector<16x16xf32> -> vector<16x16xf32>
    %c0_7 = arith.constant 0 : index
    %c0_8 = arith.constant 0 : index
    %c0_9 = arith.constant 0 : index
    %6 = vector.load %arg4[%c0_7, %c0_8, %c0_9] : memref<4x16x16xf32, #tpu.memory_space<vmem>>, vector<1x16x16xf32>
    %7 = vector.shape_cast %6 : vector<1x16x16xf32> to vector<16x16xf32>
    %8 = vector.shape_cast %5 : vector<16x16xf32> to vector<1x16x16xf32>
    tpu.vector_store %arg4[%c0_7, %c0_8, %c0_9], %8 {strides = array<i32>} : memref<4x16x16xf32, #tpu.memory_space<vmem>>, vector<1x16x16xf32>,
    %c1 = arith.constant 1 : index
    %c0_10 = arith.constant 0 : index
    %c0_11 = arith.constant 0 : index
    %9 = vector.load %arg3[%c1, %c0_10, %c0_11] : memref<4x8x8xf32, #tpu.memory_space<vmem>>, vector<1x8x8xf32>
    %10 = vector.shape_cast %9 : vector<1x8x8xf32> to vector<8x8xf32>
    %cst_12 = arith.constant dense<0.000000e+00> : vector<16x8xf32>
    %11 = tpu.matmul %0, %10, %cst_12 {dimension_numbers = #tpu.dot_dimension_numbers<[1], [0], [0], [1], [0, 0, 1, 1], [], []>} : vector<16x8xf32>, vector<8x8xf32>, vector<16x8xf32> -> vector<16x8xf32>
    %cst_13 = arith.constant dense<0.000000e+00> : vector<16x16xf32>
    %12 = tpu.matmul %11, %1, %cst_13 {dimension_numbers = #tpu.dot_dimension_numbers<[1], [0], [0], [1], [0, 0, 1, 1], [], []>} : vector<16x8xf32>, vector<8x16xf32>, vector<16x16xf32> -> vector<16x16xf32>
    %c1_14 = arith.constant 1 : index
    %c0_15 = arith.constant 0 : index
    %c0_16 = arith.constant 0 : index
    %13 = vector.load %arg4[%c1_14, %c0_15, %c0_16] : memref<4x16x16xf32, #tpu.memory_space<vmem>>, vector<1x16x16xf32>
    %14 = vector.shape_cast %13 : vector<1x16x16xf32> to vector<16x16xf32>
    %15 = vector.shape_cast %12 : vector<16x16xf32> to vector<1x16x16xf32>
    tpu.vector_store %arg4[%c1_14, %c0_15, %c0_16], %15 {strides = array<i32>} : memref<4x16x16xf32, #tpu.memory_space<vmem>>, vector<1x16x16xf32>,
    %c2 = arith.constant 2 : index
    %c0_17 = arith.constant 0 : index
    %c0_18 = arith.constant 0 : index
    %16 = vector.load %arg3[%c2, %c0_17, %c0_18] : memref<4x8x8xf32, #tpu.memory_space<vmem>>, vector<1x8x8xf32>
    %17 = vector.shape_cast %16 : vector<1x8x8xf32> to vector<8x8xf32>
    %cst_19 = arith.constant dense<0.000000e+00> : vector<16x8xf32>
    %18 = tpu.matmul %0, %17, %cst_19 {dimension_numbers = #tpu.dot_dimension_numbers<[1], [0], [0], [1], [0, 0, 1, 1], [], []>} : vector<16x8xf32>, vector<8x8xf32>, vector<16x8xf32> -> vector<16x8xf32>
    %cst_20 = arith.constant dense<0.000000e+00> : vector<16x16xf32>
    %19 = tpu.matmul %18, %1, %cst_20 {dimension_numbers = #tpu.dot_dimension_numbers<[1], [0], [0], [1], [0, 0, 1, 1], [], []>} : vector<16x8xf32>, vector<8x16xf32>, vector<16x16xf32> -> vector<16x16xf32>
    %c2_21 = arith.constant 2 : index
    %c0_22 = arith.constant 0 : index
    %c0_23 = arith.constant 0 : index
    %20 = vector.load %arg4[%c2_21, %c0_22, %c0_23] : memref<4x16x16xf32, #tpu.memory_space<vmem>>, vector<1x16x16xf32>
    %21 = vector.shape_cast %20 : vector<1x16x16xf32> to vector<16x16xf32>
    %22 = vector.shape_cast %19 : vector<16x16xf32> to vector<1x16x16xf32>
    tpu.vector_store %arg4[%c2_21, %c0_22, %c0_23], %22 {strides = array<i32>} : memref<4x16x16xf32, #tpu.memory_space<vmem>>, vector<1x16x16xf32>,
    %c3 = arith.constant 3 : index
    %c0_24 = arith.constant 0 : index
    %c0_25 = arith.constant 0 : index
    %23 = vector.load %arg3[%c3, %c0_24, %c0_25] : memref<4x8x8xf32, #tpu.memory_space<vmem>>, vector<1x8x8xf32>
    %24 = vector.shape_cast %23 : vector<1x8x8xf32> to vector<8x8xf32>
    %cst_26 = arith.constant dense<0.000000e+00> : vector<16x8xf32>
    %25 = tpu.matmul %0, %24, %cst_26 {dimension_numbers = #tpu.dot_dimension_numbers<[1], [0], [0], [1], [0, 0, 1, 1], [], []>} : vector<16x8xf32>, vector<8x8xf32>, vector<16x8xf32> -> vector<16x8xf32>
    %cst_27 = arith.constant dense<0.000000e+00> : vector<16x16xf32>
    %26 = tpu.matmul %25, %1, %cst_27 {dimension_numbers = #tpu.dot_dimension_numbers<[1], [0], [0], [1], [0, 0, 1, 1], [], []>} : vector<16x8xf32>, vector<8x16xf32>, vector<16x16xf32> -> vector<16x16xf32>
    %c3_28 = arith.constant 3 : index
    %c0_29 = arith.constant 0 : index
    %c0_30 = arith.constant 0 : index
    %27 = vector.load %arg4[%c3_28, %c0_29, %c0_30] : memref<4x16x16xf32, #tpu.memory_space<vmem>>, vector<1x16x16xf32>
    %28 = vector.shape_cast %27 : vector<1x16x16xf32> to vector<16x16xf32>
    %29 = vector.shape_cast %26 : vector<16x16xf32> to vector<1x16x16xf32>
    tpu.vector_store %arg4[%c3_28, %c0_29, %c0_30], %29 {strides = array<i32>} : memref<4x16x16xf32, #tpu.memory_space<vmem>>, vector<1x16x16xf32>,
    return
  }
  func.func @transform_0(%arg0: i32) -> (i32, i32) {
    %c0_i32 = arith.constant 0 : i32
    %c0_i32_0 = arith.constant 0 : i32
    %c0_i32_1 = arith.constant 0 : i32
    return %c0_i32, %c0_i32_0 : i32, i32
  }
  func.func @transform_1(%arg0: i32) -> (i32, i32) {
    %c0_i32 = arith.constant 0 : i32
    %c0_i32_0 = arith.constant 0 : i32
    %c0_i32_1 = arith.constant 0 : i32
    return %c0_i32, %c0_i32_0 : i32, i32
  }
  func.func @transform_2(%arg0: i32) -> (i32, i32, i32) {
    %c0_i32 = arith.constant 0 : i32
    %c0_i32_0 = arith.constant 0 : i32
    %c0_i32_1 = arith.constant 0 : i32
    %c0_i32_2 = arith.constant 0 : i32
    return %c0_i32, %c0_i32_0, %c0_i32_1 : i32, i32, i32
  }
  func.func @transform_3(%arg0: i32) -> (i32, i32, i32) {
    %c0_i32 = arith.constant 0 : i32
    %c0_i32_0 = arith.constant 0 : i32
    %c0_i32_1 = arith.constant 0 : i32
    %c0_i32_2 = arith.constant 0 : i32
    return %c0_i32, %c0_i32_0, %c0_i32_1 : i32, i32, i32
  }
}

</mosaic_0001>

<bundles_post_ra>
// kernel: simplify_net_forward.7
= control target key start
LH: loop header
LB: loop body
LE: loop exit
PB: predicated region body
PF: predicated region fallthrough
CT: control target
= control target key end

     0   :  { %vm30_vm0 = vcmask 1042432   ;;  %vm23_vm1 = vcmask 220160   ;;  %v201_v10 = vmov 0   ;;  %s265_s1 = inlined_call_operand.vmem [shape: f32[27,128], index: 1, kind: input, shape index: {}]   ;;  %s266_s0 = inlined_call_operand.vmem [shape: f32[16,27], index: 0, kind: input, shape index: {}]   ;;  %s267_s2 = inlined_call_operand.vmem [shape: f32[16,1], index: 2, kind: input, shape index: {}]   ;;  %s268_s3 = inlined_call_operand.vmem [shape: f32[16,1], index: 3, kind: input, shape index: {}]   ;;  %s269_s4 = inlined_call_operand.vmem [shape: f32[16,128], index: 4, kind: output, shape index: {}]  }
   0x1   :  { %v22_v0 = vld [vmem:[%s265_s1 + $0x18] sm:$0x7]  ;;  %v21_v1 = vld [vmem:[%s265_s1 + $0x10] sm:$0xff]  ;;  %v17_v2 = vld [vmem:[%s266_s0] sm:$0xff]  ;;  %195 = vset.pattern.permute.xlu0 %v201_v10  ;;  %196 = vset.pattern.permute.xlu1 %v201_v10 }
   0x2   :  { %183 = vmatprep.subr.msk.mxu0 %vm30_vm0, %v22_v0  ;;  %v20_v3 = vld [vmem:[%s265_s1 + $0x8] sm:$0xff]  ;;  %191 = vmatprep.mubr.msk.f32.mxu0 %vm23_vm1, %v17_v2  ;;  %v19_v4 = vld [vmem:[%s265_s1] sm:$0xff] }
   0x3   :  { %184 = vmatpush3.msk.msra.mxu0 %vm30_vm0, %v22_v0  ;;  %v18_v5 = vld [vmem:[%s266_s0 + $0x8] sm:$0xff]  ;;  %v128_v25 = vld [vmem:[%s267_s2] sm:$0xff] }
   0x4   :  { %185 = vmatprep.subr.mxu0 %v21_v1  ;;  %v129_v28 = vld [vmem:[%s267_s2 + $0x8] sm:$0xff]  ;;  %v136_v32 = vld [vmem:[%s268_s3] sm:$0xff] }
   0x5   :  { %186 = vmatpush3.msra.mxu0 %v21_v1  ;;  %v137_v35 = vld [vmem:[%s268_s3 + $0x8] sm:$0xff] }
   0x6   :  { %187 = vmatprep.subr.mxu0 %v20_v3 }
   0x7   :  { %188 = vmatpush3.msra.mxu0 %v20_v3 }
   0x8   :  { %189 = vmatprep.subr.mxu0 %v19_v4 }
   0x9   :  { %190 = vmatpush3.msra.mxu0 %v19_v4 }
   0xa   :  { %192 = vmatmul.mubr.msk.f32.vlgmr.msra.gmra.mxu0 %vm23_vm1, %v18_v5 }
  0xca   :  { %v193_v6 = vpop.f32.mrf.mxu0 }
  0xcb   :  { %v117_v9 = vmul.f32 %v193_v6, %v193_v6 }
  0xcc   :  { %v100_v7 = vpop.f32.mrf.mxu0 }
  0xcd   :  { %109 = vadd.xlane.f32.xlu0 %v100_v7  ;;  %v116_v8 = vmul.f32 %v100_v7, %v100_v7 }
  0xcf   :  { %118 = vadd.xlane.f32.xlu1 %v116_v8 }
  0xd1   :  { %111 = vadd.xlane.f32.xlu0 %v193_v6 }
  0xd3   :  { %120 = vadd.xlane.f32.xlu1 %v117_v9 }
 0x156   :  { %v110_v11 = vpop.xlane.xlu0 %109 }
 0x157   :  { %v114_v12 = vmul.f32 0.0078125, %v110_v11 }
 0x158   :  { %v119_v13 = vpop.xlane.xlu1 %118 }
 0x159   :  { %v124_v14 = vmul.f32 %v114_v12, %v114_v12  ;;  %v122_v15 = vmul.f32 0.0078125, %v119_v13 }
 0x15a   :  { %v112_v16 = vpop.xlane.xlu0 %111 }
 0x15b   :  { %v126_v17 = vsub.f32 %v122_v15, %v124_v14  ;;  %v115_v18 = vmul.f32 0.0078125, %v112_v16 }
 0x15c   :  { %v121_v19 = vpop.xlane.xlu1 %120 }
 0x15d   :  { %v130_v20 = vadd.f32 1e-05, %v126_v17  ;;  %v125_v21 = vmul.f32 %v115_v18, %v115_v18  ;;  %v123_v22 = vmul.f32 0.0078125, %v121_v19 }
 0x15f   :  { %197 = vrsqrt.f32 %v130_v20  ;;  %v127_v23 = vsub.f32 %v123_v22, %v125_v21 }
 0x161   :  { %v131_v24 = vadd.f32 1e-05, %v127_v23 }
 0x163   :  { %199 = vrsqrt.f32 %v131_v24 }
 0x16c   :  { %v198_v26 = vpop.eup %197 }
 0x16d   :  { %v134_v27 = vmul.f32 %v198_v26, %v128_v25 }
 0x16f   :  { %144 = vperm.xlu0 %195, %v134_v27   ;;  %v138_v31 = vmul.f32 %v134_v27, %v114_v12 }
 0x170   :  { %v200_v29 = vpop.eup %199 }
 0x171   :  { %v135_v30 = vmul.f32 %v200_v29, %v129_v28  ;;  %v140_v33 = vsub.f32 %v136_v32, %v138_v31 }
 0x173   :  { %149 = vperm.xlu1 %196, %v135_v30   ;;  %v139_v34 = vmul.f32 %v135_v30, %v115_v18 }
 0x175   :  { %v141_v36 = vsub.f32 %v137_v35, %v139_v34 }
 0x177   :  { %156 = vperm.xlu1 %196, %v140_v33  }
 0x17b   :  { %161 = vperm.xlu1 %196, %v141_v36  }
 0x1ea   :  { %v145_v37 = vpop.permute.xlu0 %144 }
 0x1eb   :  { %v152_v39 = vmul.f32 %v145_v37, %v100_v7 }
 0x1ee   :  { %v150_v38 = vpop.permute.xlu1 %149 }
 0x1ef   :  { %v153_v42 = vmul.f32 %v193_v6, %v150_v38 }
 0x1f2   :  { %v157_v40 = vpop.permute.xlu1 %156 }
 0x1f3   :  { %v164_v41 = vadd.f32 %v157_v40, %v152_v39 }
 0x1f5   :  { %v166_v43 = vmax.f32 %v164_v41, 0.0 }
 0x1f6   :  { %v162_v44 = vpop.permute.xlu1 %161 }
 0x1f7   :  { %168 = vst [vmem:[%s269_s4] sm:$0xff] %v166_v43  ;;  %v165_v45 = vadd.f32 %v162_v44, %v153_v42 }
 0x1f9   :  { %v167_v46 = vmax.f32 %v165_v45, 0.0 }
 0x1fb   :  { %169 = vst [vmem:[%s269_s4 + $0x8] sm:$0xff] %v167_v46 }

// kernel: simplify_net_forward.8
= control target key start
LH: loop header
LB: loop body
LE: loop exit
PB: predicated region body
PF: predicated region fallthrough
CT: control target
= control target key end

     0   :  { %v237_v0 = vmov 0.0   ;;  %vm39_vm0 = vcmask 130048   ;;  %vm121_vm1 = vcmask 261120   ;;  %v238_v33 = vmov 0   ;;  %s390_s1 = inlined_call_operand.vmem [shape: f32[144,32], index: 1, kind: input, shape index: {}]   ;;  %s391_s0 = inlined_call_operand.vmem [shape: f32[16,144], index: 0, kind: input, shape index: {}]   ;;  %s392_s2 = inlined_call_operand.vmem [shape: f32[16,1], index: 2, kind: input, shape index: {}]   ;;  %s393_s3 = inlined_call_operand.vmem [shape: f32[16,1], index: 3, kind: input, shape index: {}]   ;;  %s394_s4 = inlined_call_operand.vmem [shape: f32[16,32], index: 4, kind: output, shape index: {}]  }
   0x1   :  { %46 = vmatprep.subr.mxu0 %v237_v0  ;;  %v36_v1 = vld [vmem:[%s390_s1 + $0x78] sm:$0xff]  ;;  %193 = vmatprep.subr.mxu1 %v237_v0  ;;  %v35_v2 = vld [vmem:[%s390_s1 + $0x70] sm:$0xff]  ;;  %v34_v3 = vld [vmem:[%s390_s1 + $0x68] sm:$0xff] }
   0x2   :  { %47 = vmatpush1.msra.mxu0 %v36_v1  ;;  %211 = vmatpush1.msra.mxu1 %v36_v1  ;;  %v33_v4 = vld [vmem:[%s390_s1 + $0x60] sm:$0xff]  ;;  %v32_v5 = vld [vmem:[%s390_s1 + $0x58] sm:$0xff]  ;;  %v31_v6 = vld [vmem:[%s390_s1 + $0x50] sm:$0xff] }
   0x3   :  { %48 = vmatprep.subr.mxu0 %v237_v0  ;;  %194 = vmatprep.subr.mxu1 %v237_v0  ;;  %v30_v7 = vld [vmem:[%s390_s1 + $0x48] sm:$0xff]  ;;  %v29_v8 = vld [vmem:[%s390_s1 + $0x40] sm:$0xff]  ;;  %v28_v9 = vld [vmem:[%s390_s1 + $0x38] sm:$0xff] }
   0x4   :  { %49 = vmatpush1.msra.mxu0 %v35_v2  ;;  %212 = vmatpush1.msra.mxu1 %v35_v2  ;;  %v27_v10 = vld [vmem:[%s390_s1 + $0x30] sm:$0xff]  ;;  %v26_v11 = vld [vmem:[%s390_s1 + $0x28] sm:$0xff]  ;;  %v25_v12 = vld [vmem:[%s390_s1 + $0x20] sm:$0xff] }
   0x5   :  { %50 = vmatprep.subr.mxu0 %v237_v0  ;;  %195 = vmatprep.subr.mxu1 %v237_v0  ;;  %v24_v13 = vld [vmem:[%s390_s1 + $0x18] sm:$0xff]  ;;  %v23_v14 = vld [vmem:[%s390_s1 + $0x10] sm:$0xff]  ;;  %v22_v15 = vld [vmem:[%s390_s1 + $0x8] sm:$0xff] }
   0x6   :  { %51 = vmatpush1.msra.mxu0 %v34_v3  ;;  %213 = vmatpush1.msra.mxu1 %v34_v3  ;;  %v21_v16 = vld [vmem:[%s390_s1] sm:$0xff]  ;;  %v38_v17 = vld [vmem:[%s390_s1 + $0x88] sm:$0xff]  ;;  %v20_v21 = vld [vmem:[%s391_s0 + $0x18] sm:$0xff] }
   0x7   :  { %52 = vmatprep.subr.mxu0 %v237_v0  ;;  %196 = vmatprep.subr.mxu1 %v237_v0  ;;  %v18_v18 = vld [vmem:[%s391_s0 + $0x8] sm:$0xff]  ;;  %v37_v19 = vld [vmem:[%s390_s1 + $0x80] sm:$0xff]  ;;  %v19_v22 = vld [vmem:[%s391_s0 + $0x10] sm:$0xff] }
   0x8   :  { %53 = vmatpush1.msra.mxu0 %v33_v4  ;;  %214 = vmatpush1.msra.mxu1 %v33_v4  ;;  %v17_v20 = vld [vmem:[%s391_s0] sm:$0xff]  ;;  %v146_v51 = vld [vmem:[%s392_s2 + $0x8] sm:$0xff] }
   0x9   :  { %54 = vmatprep.subr.mxu0 %v237_v0  ;;  %197 = vmatprep.subr.mxu1 %v237_v0  ;;  %v145_v48 = vld [vmem:[%s392_s2] sm:$0xff]  ;;  %v154_v58 = vld [vmem:[%s393_s3 + $0x8] sm:$0xff] }
   0xa   :  { %55 = vmatpush1.msra.mxu0 %v32_v5  ;;  %215 = vmatpush1.msra.mxu1 %v32_v5  ;;  %v153_v55 = vld [vmem:[%s393_s3] sm:$0xff] }
   0xb   :  { %56 = vmatprep.subr.mxu0 %v237_v0  ;;  %198 = vmatprep.subr.mxu1 %v237_v0 }
   0xc   :  { %57 = vmatpush1.msra.mxu0 %v31_v6  ;;  %216 = vmatpush1.msra.mxu1 %v31_v6 }
   0xd   :  { %58 = vmatprep.subr.mxu0 %v237_v0  ;;  %199 = vmatprep.subr.mxu1 %v237_v0 }
   0xe   :  { %59 = vmatpush1.msra.mxu0 %v30_v7  ;;  %217 = vmatpush1.msra.mxu1 %v30_v7 }
   0xf   :  { %60 = vmatprep.subr.mxu0 %v237_v0  ;;  %200 = vmatprep.subr.mxu1 %v237_v0 }
  0x10   :  { %61 = vmatpush1.msra.mxu0 %v29_v8  ;;  %218 = vmatpush1.msra.mxu1 %v29_v8 }
  0x11   :  { %62 = vmatprep.subr.mxu0 %v237_v0  ;;  %201 = vmatprep.subr.mxu1 %v237_v0 }
  0x12   :  { %63 = vmatpush1.msra.mxu0 %v28_v9  ;;  %219 = vmatpush1.msra.mxu1 %v28_v9 }
  0x13   :  { %64 = vmatprep.subr.mxu0 %v237_v0  ;;  %202 = vmatprep.subr.mxu1 %v237_v0 }
  0x14   :  { %65 = vmatpush1.msra.mxu0 %v27_v10  ;;  %220 = vmatpush1.msra.mxu1 %v27_v10 }
  0x15   :  { %66 = vmatprep.subr.mxu0 %v237_v0  ;;  %203 = vmatprep.subr.mxu1 %v237_v0 }
  0x16   :  { %67 = vmatpush1.msra.mxu0 %v26_v11  ;;  %221 = vmatpush1.msra.mxu1 %v26_v11 }
  0x17   :  { %68 = vmatprep.subr.mxu0 %v237_v0  ;;  %204 = vmatprep.subr.mxu1 %v237_v0 }
  0x18   :  { %69 = vmatpush1.msra.mxu0 %v25_v12  ;;  %222 = vmatpush1.msra.mxu1 %v25_v12 }
  0x19   :  { %70 = vmatprep.subr.mxu0 %v237_v0  ;;  %205 = vmatprep.subr.mxu1 %v237_v0 }
  0x1a   :  { %71 = vmatpush1.msra.mxu0 %v24_v13  ;;  %223 = vmatpush1.msra.mxu1 %v24_v13 }
  0x1b   :  { %72 = vmatprep.subr.mxu0 %v237_v0  ;;  %206 = vmatprep.subr.mxu1 %v237_v0 }
  0x1c   :  { %73 = vmatpush1.msra.mxu0 %v23_v14  ;;  %224 = vmatpush1.msra.mxu1 %v23_v14 }
  0x1d   :  { %74 = vmatprep.subr.mxu0 %v237_v0  ;;  %207 = vmatprep.subr.mxu1 %v237_v0 }
  0x1e   :  { %75 = vmatpush1.msra.mxu0 %v22_v15  ;;  %225 = vmatpush1.msra.mxu1 %v22_v15 }
  0x1f   :  { %76 = vmatprep.subr.mxu0 %v237_v0  ;;  %208 = vmatprep.subr.mxu1 %v237_v0 }
  0x20   :  { %77 = vmatpush1.msra.mxu0 %v21_v16  ;;  %226 = vmatpush1.msra.mxu1 %v21_v16 }
  0x21   :  { %106 = vmatprep.subr.mxu0 %v237_v0  ;;  %209 = vmatprep.subr.mxu1 %v237_v0 }
  0x22   :  { %107 = vmatpush2.msra.mxu0 %v38_v17  ;;  %227 = vmatpush2.msra.mxu1 %v38_v17 }
  0x23   :  { %108 = vmatprep.subr.mxu0 %v237_v0  ;;  %191 = vmatprep.mubr.msk.f32.mxu0 %vm39_vm0, %v18_v18 }
  0x24   :  { %109 = vmatpush2.msra.mxu0 %v37_v19  ;;  %210 = vmatprep.subr.mxu1 %v237_v0 }
  0x25   :  { %111 = vmatmul.mubr.f32.vlgmr.msra.gmra.mxu0 %v17_v20  ;;  %228 = vmatpush2.msra.mxu1 %v37_v19 }
  0x26   :  { %192 = vmatprep.mubr.msk.f32.mxu1 %vm39_vm0, %v20_v21  ;;  %231 = vset.pattern.permute.xlu0 %v238_v33 }
  0x27   :  { %116 = vmatmul.mubr.f32.vlgmr.msra.gmra.mxu1 %v19_v22  ;;  %232 = vset.pattern.permute.xlu1 %v238_v33 }
  0xe5   :  { %v112_v23 = vpop.f32.mrf.mxu0 }
  0xe6   :  { %v122_v24 = vsel %vm121_vm1, %v112_v23, 0.0  ;;  %v131_v25 = vmul.f32 %v112_v23, %v112_v23 }
  0xe7   :  { %v117_v26 = vpop.f32.mrf.mxu1  ;;  %123 = vadd.xlane.f32.xlu0 %v122_v24  ;;  %v114_v27 = vpop.f32.mrf.mxu0 }
  0xe8   :  { %v133_v28 = vsel %vm121_vm1, %v131_v25, 0.0  ;;  %v125_v29 = vsel %vm121_vm1, %v117_v26, 0.0  ;;  %v132_v30 = vmul.f32 %v117_v26, %v117_v26 }
  0xe9   :  { %v119_v31 = vpop.f32.mrf.mxu1  ;;  %134 = vadd.xlane.f32.xlu1 %v133_v28 }
  0xea   :  { %v136_v32 = vsel %vm121_vm1, %v132_v30, 0.0 }
  0xeb   :  { %126 = vadd.xlane.f32.xlu0 %v125_v29 }
  0xed   :  { %137 = vadd.xlane.f32.xlu1 %v136_v32 }
 0x170   :  { %v124_v34 = vpop.xlane.xlu0 %123 }
 0x171   :  { %v129_v35 = vmul.f32 0.03125, %v124_v34 }
 0x172   :  { %v135_v36 = vpop.xlane.xlu1 %134 }
 0x173   :  { %v141_v37 = vmul.f32 %v129_v35, %v129_v35  ;;  %v139_v38 = vmul.f32 0.03125, %v135_v36 }
 0x174   :  { %v127_v39 = vpop.xlane.xlu0 %126 }
 0x175   :  { %v143_v40 = vsub.f32 %v139_v38, %v141_v37  ;;  %v130_v41 = vmul.f32 0.03125, %v127_v39 }
 0x176   :  { %v138_v42 = vpop.xlane.xlu1 %137 }
 0x177   :  { %v147_v43 = vadd.f32 1e-05, %v143_v40  ;;  %v142_v44 = vmul.f32 %v130_v41, %v130_v41  ;;  %v140_v45 = vmul.f32 0.03125, %v138_v42 }
 0x179   :  { %233 = vrsqrt.f32 %v147_v43  ;;  %v144_v46 = vsub.f32 %v140_v45, %v142_v44 }
 0x17b   :  { %v148_v47 = vadd.f32 1e-05, %v144_v46 }
 0x17d   :  { %235 = vrsqrt.f32 %v148_v47 }
 0x186   :  { %v234_v49 = vpop.eup %233 }
 0x187   :  { %v151_v50 = vmul.f32 %v234_v49, %v145_v48 }
 0x189   :  { %161 = vperm.xlu0 %231, %v151_v50   ;;  %v155_v54 = vmul.f32 %v151_v50, %v129_v35 }
 0x18a   :  { %v236_v52 = vpop.eup %235 }
 0x18b   :  { %v152_v53 = vmul.f32 %v236_v52, %v146_v51  ;;  %v157_v56 = vsub.f32 %v153_v55, %v155_v54 }
 0x18d   :  { %166 = vperm.xlu1 %232, %v152_v53   ;;  %v156_v57 = vmul.f32 %v152_v53, %v130_v41 }
 0x18f   :  { %v158_v59 = vsub.f32 %v154_v58, %v156_v57 }
 0x191   :  { %173 = vperm.xlu1 %232, %v157_v56  }
 0x195   :  { %178 = vperm.xlu1 %232, %v158_v59  }
 0x204   :  { %v162_v60 = vpop.permute.xlu0 %161 }
 0x205   :  { %v169_v62 = vmul.f32 %v162_v60, %v112_v23 }
 0x208   :  { %v167_v61 = vpop.permute.xlu1 %166 }
 0x209   :  { %v170_v1 = vmul.f32 %v167_v61, %v117_v26 }
 0x20c   :  { %v174_v63 = vpop.permute.xlu1 %173 }
 0x20d   :  { %v181_v0 = vadd.f32 %v174_v63, %v169_v62 }
 0x20f   :  { %v183_v2 = vmax.f32 %v181_v0, 0.0 }
 0x210   :  { %v179_v3 = vpop.permute.xlu1 %178 }
 0x211   :  { %185 = vst.msk [vmem:[%s394_s4] sm:$0xff] %vm121_vm1, %v183_v2  ;;  %v182_v4 = vadd.f32 %v179_v3, %v170_v1 }
 0x213   :  { %v184_v5 = vmax.f32 %v182_v4, 0.0 }
 0x215   :  { %186 = vst.msk [vmem:[%s394_s4 + $0x8] sm:$0xff] %vm121_vm1, %v184_v5 }

// kernel: simplify_net_forward.9
= control target key start
LH: loop header
LB: loop body
LE: loop exit
PB: predicated region body
PF: predicated region fallthrough
CT: control target
= control target key end

     0   :  { %v237_v0 = vmov 0.0   ;;  %vm39_vm0 = vcmask 130048   ;;  %vm121_vm1 = vcmask 64512   ;;  %v238_v33 = vmov 0   ;;  %s390_s1 = inlined_call_operand.vmem [shape: f32[144,8], index: 1, kind: input, shape index: {}]   ;;  %s391_s0 = inlined_call_operand.vmem [shape: f32[16,144], index: 0, kind: input, shape index: {}]   ;;  %s392_s2 = inlined_call_operand.vmem [shape: f32[16,1], index: 2, kind: input, shape index: {}]   ;;  %s393_s3 = inlined_call_operand.vmem [shape: f32[16,1], index: 3, kind: input, shape index: {}]   ;;  %s394_s4 = inlined_call_operand.vmem [shape: f32[16,8], index: 4, kind: output, shape index: {}]  }
   0x1   :  { %46 = vmatprep.subr.mxu0 %v237_v0  ;;  %v36_v1 = vld [vmem:[%s390_s1 + $0x78] sm:$0xff]  ;;  %193 = vmatprep.subr.mxu1 %v237_v0  ;;  %v35_v2 = vld [vmem:[%s390_s1 + $0x70] sm:$0xff]  ;;  %v34_v3 = vld [vmem:[%s390_s1 + $0x68] sm:$0xff] }
   0x2   :  { %47 = vmatpush1.msra.mxu0 %v36_v1  ;;  %211 = vmatpush1.msra.mxu1 %v36_v1  ;;  %v33_v4 = vld [vmem:[%s390_s1 + $0x60] sm:$0xff]  ;;  %v32_v5 = vld [vmem:[%s390_s1 + $0x58] sm:$0xff]  ;;  %v31_v6 = vld [vmem:[%s390_s1 + $0x50] sm:$0xff] }
   0x3   :  { %48 = vmatprep.subr.mxu0 %v237_v0  ;;  %194 = vmatprep.subr.mxu1 %v237_v0  ;;  %v30_v7 = vld [vmem:[%s390_s1 + $0x48] sm:$0xff]  ;;  %v29_v8 = vld [vmem:[%s390_s1 + $0x40] sm:$0xff]  ;;  %v28_v9 = vld [vmem:[%s390_s1 + $0x38] sm:$0xff] }
   0x4   :  { %49 = vmatpush1.msra.mxu0 %v35_v2  ;;  %212 = vmatpush1.msra.mxu1 %v35_v2  ;;  %v27_v10 = vld [vmem:[%s390_s1 + $0x30] sm:$0xff]  ;;  %v26_v11 = vld [vmem:[%s390_s1 + $0x28] sm:$0xff]  ;;  %v25_v12 = vld [vmem:[%s390_s1 + $0x20] sm:$0xff] }
   0x5   :  { %50 = vmatprep.subr.mxu0 %v237_v0  ;;  %195 = vmatprep.subr.mxu1 %v237_v0  ;;  %v24_v13 = vld [vmem:[%s390_s1 + $0x18] sm:$0xff]  ;;  %v23_v14 = vld [vmem:[%s390_s1 + $0x10] sm:$0xff]  ;;  %v22_v15 = vld [vmem:[%s390_s1 + $0x8] sm:$0xff] }
   0x6   :  { %51 = vmatpush1.msra.mxu0 %v34_v3  ;;  %213 = vmatpush1.msra.mxu1 %v34_v3  ;;  %v21_v16 = vld [vmem:[%s390_s1] sm:$0xff]  ;;  %v38_v17 = vld [vmem:[%s390_s1 + $0x88] sm:$0xff]  ;;  %v20_v21 = vld [vmem:[%s391_s0 + $0x18] sm:$0xff] }
   0x7   :  { %52 = vmatprep.subr.mxu0 %v237_v0  ;;  %196 = vmatprep.subr.mxu1 %v237_v0  ;;  %v18_v18 = vld [vmem:[%s391_s0 + $0x8] sm:$0xff]  ;;  %v37_v19 = vld [vmem:[%s390_s1 + $0x80] sm:$0xff]  ;;  %v19_v22 = vld [vmem:[%s391_s0 + $0x10] sm:$0xff] }
   0x8   :  { %53 = vmatpush1.msra.mxu0 %v33_v4  ;;  %214 = vmatpush1.msra.mxu1 %v33_v4  ;;  %v17_v20 = vld [vmem:[%s391_s0] sm:$0xff]  ;;  %v146_v51 = vld [vmem:[%s392_s2 + $0x8] sm:$0xff] }
   0x9   :  { %54 = vmatprep.subr.mxu0 %v237_v0  ;;  %197 = vmatprep.subr.mxu1 %v237_v0  ;;  %v145_v48 = vld [vmem:[%s392_s2] sm:$0xff]  ;;  %v154_v58 = vld [vmem:[%s393_s3 + $0x8] sm:$0xff] }
   0xa   :  { %55 = vmatpush1.msra.mxu0 %v32_v5  ;;  %215 = vmatpush1.msra.mxu1 %v32_v5  ;;  %v153_v55 = vld [vmem:[%s393_s3] sm:$0xff] }
   0xb   :  { %56 = vmatprep.subr.mxu0 %v237_v0  ;;  %198 = vmatprep.subr.mxu1 %v237_v0 }
   0xc   :  { %57 = vmatpush1.msra.mxu0 %v31_v6  ;;  %216 = vmatpush1.msra.mxu1 %v31_v6 }
   0xd   :  { %58 = vmatprep.subr.mxu0 %v237_v0  ;;  %199 = vmatprep.subr.mxu1 %v237_v0 }
   0xe   :  { %59 = vmatpush1.msra.mxu0 %v30_v7  ;;  %217 = vmatpush1.msra.mxu1 %v30_v7 }
   0xf   :  { %60 = vmatprep.subr.mxu0 %v237_v0  ;;  %200 = vmatprep.subr.mxu1 %v237_v0 }
  0x10   :  { %61 = vmatpush1.msra.mxu0 %v29_v8  ;;  %218 = vmatpush1.msra.mxu1 %v29_v8 }
  0x11   :  { %62 = vmatprep.subr.mxu0 %v237_v0  ;;  %201 = vmatprep.subr.mxu1 %v237_v0 }
  0x12   :  { %63 = vmatpush1.msra.mxu0 %v28_v9  ;;  %219 = vmatpush1.msra.mxu1 %v28_v9 }
  0x13   :  { %64 = vmatprep.subr.mxu0 %v237_v0  ;;  %202 = vmatprep.subr.mxu1 %v237_v0 }
  0x14   :  { %65 = vmatpush1.msra.mxu0 %v27_v10  ;;  %220 = vmatpush1.msra.mxu1 %v27_v10 }
  0x15   :  { %66 = vmatprep.subr.mxu0 %v237_v0  ;;  %203 = vmatprep.subr.mxu1 %v237_v0 }
  0x16   :  { %67 = vmatpush1.msra.mxu0 %v26_v11  ;;  %221 = vmatpush1.msra.mxu1 %v26_v11 }
  0x17   :  { %68 = vmatprep.subr.mxu0 %v237_v0  ;;  %204 = vmatprep.subr.mxu1 %v237_v0 }
  0x18   :  { %69 = vmatpush1.msra.mxu0 %v25_v12  ;;  %222 = vmatpush1.msra.mxu1 %v25_v12 }
  0x19   :  { %70 = vmatprep.subr.mxu0 %v237_v0  ;;  %205 = vmatprep.subr.mxu1 %v237_v0 }
  0x1a   :  { %71 = vmatpush1.msra.mxu0 %v24_v13  ;;  %223 = vmatpush1.msra.mxu1 %v24_v13 }
  0x1b   :  { %72 = vmatprep.subr.mxu0 %v237_v0  ;;  %206 = vmatprep.subr.mxu1 %v237_v0 }
  0x1c   :  { %73 = vmatpush1.msra.mxu0 %v23_v14  ;;  %224 = vmatpush1.msra.mxu1 %v23_v14 }
  0x1d   :  { %74 = vmatprep.subr.mxu0 %v237_v0  ;;  %207 = vmatprep.subr.mxu1 %v237_v0 }
  0x1e   :  { %75 = vmatpush1.msra.mxu0 %v22_v15  ;;  %225 = vmatpush1.msra.mxu1 %v22_v15 }
  0x1f   :  { %76 = vmatprep.subr.mxu0 %v237_v0  ;;  %208 = vmatprep.subr.mxu1 %v237_v0 }
  0x20   :  { %77 = vmatpush1.msra.mxu0 %v21_v16  ;;  %226 = vmatpush1.msra.mxu1 %v21_v16 }
  0x21   :  { %106 = vmatprep.subr.mxu0 %v237_v0  ;;  %209 = vmatprep.subr.mxu1 %v237_v0 }
  0x22   :  { %107 = vmatpush2.msra.mxu0 %v38_v17  ;;  %227 = vmatpush2.msra.mxu1 %v38_v17 }
  0x23   :  { %108 = vmatprep.subr.mxu0 %v237_v0  ;;  %191 = vmatprep.mubr.msk.f32.mxu0 %vm39_vm0, %v18_v18 }
  0x24   :  { %109 = vmatpush2.msra.mxu0 %v37_v19  ;;  %210 = vmatprep.subr.mxu1 %v237_v0 }
  0x25   :  { %111 = vmatmul.mubr.f32.vlgmr.msra.gmra.mxu0 %v17_v20  ;;  %228 = vmatpush2.msra.mxu1 %v37_v19 }
  0x26   :  { %192 = vmatprep.mubr.msk.f32.mxu1 %vm39_vm0, %v20_v21  ;;  %231 = vset.pattern.permute.xlu0 %v238_v33 }
  0x27   :  { %116 = vmatmul.mubr.f32.vlgmr.msra.gmra.mxu1 %v19_v22  ;;  %232 = vset.pattern.permute.xlu1 %v238_v33 }
  0xe5   :  { %v112_v23 = vpop.f32.mrf.mxu0 }
  0xe6   :  { %v122_v24 = vsel %vm121_vm1, %v112_v23, 0.0  ;;  %v131_v25 = vmul.f32 %v112_v23, %v112_v23 }
  0xe7   :  { %v117_v26 = vpop.f32.mrf.mxu1  ;;  %123 = vadd.xlane.f32.xlu0 %v122_v24  ;;  %v114_v27 = vpop.f32.mrf.mxu0 }
  0xe8   :  { %v133_v28 = vsel %vm121_vm1, %v131_v25, 0.0  ;;  %v125_v29 = vsel %vm121_vm1, %v117_v26, 0.0  ;;  %v132_v30 = vmul.f32 %v117_v26, %v117_v26 }
  0xe9   :  { %v119_v31 = vpop.f32.mrf.mxu1  ;;  %134 = vadd.xlane.f32.xlu1 %v133_v28 }
  0xea   :  { %v136_v32 = vsel %vm121_vm1, %v132_v30, 0.0 }
  0xeb   :  { %126 = vadd.xlane.f32.xlu0 %v125_v29 }
  0xed   :  { %137 = vadd.xlane.f32.xlu1 %v136_v32 }
 0x170   :  { %v124_v34 = vpop.xlane.xlu0 %123 }
 0x171   :  { %v129_v35 = vmul.f32 0.125, %v124_v34 }
 0x172   :  { %v135_v36 = vpop.xlane.xlu1 %134 }
 0x173   :  { %v141_v37 = vmul.f32 %v129_v35, %v129_v35  ;;  %v139_v38 = vmul.f32 0.125, %v135_v36 }
 0x174   :  { %v127_v39 = vpop.xlane.xlu0 %126 }
 0x175   :  { %v143_v40 = vsub.f32 %v139_v38, %v141_v37  ;;  %v130_v41 = vmul.f32 0.125, %v127_v39 }
 0x176   :  { %v138_v42 = vpop.xlane.xlu1 %137 }
 0x177   :  { %v147_v43 = vadd.f32 1e-05, %v143_v40  ;;  %v142_v44 = vmul.f32 %v130_v41, %v130_v41  ;;  %v140_v45 = vmul.f32 0.125, %v138_v42 }
 0x179   :  { %233 = vrsqrt.f32 %v147_v43  ;;  %v144_v46 = vsub.f32 %v140_v45, %v142_v44 }
 0x17b   :  { %v148_v47 = vadd.f32 1e-05, %v144_v46 }
 0x17d   :  { %235 = vrsqrt.f32 %v148_v47 }
 0x186   :  { %v234_v49 = vpop.eup %233 }
 0x187   :  { %v151_v50 = vmul.f32 %v234_v49, %v145_v48 }
 0x189   :  { %161 = vperm.xlu0 %231, %v151_v50   ;;  %v155_v54 = vmul.f32 %v151_v50, %v129_v35 }
 0x18a   :  { %v236_v52 = vpop.eup %235 }
 0x18b   :  { %v152_v53 = vmul.f32 %v236_v52, %v146_v51  ;;  %v157_v56 = vsub.f32 %v153_v55, %v155_v54 }
 0x18d   :  { %166 = vperm.xlu1 %232, %v152_v53   ;;  %v156_v57 = vmul.f32 %v152_v53, %v130_v41 }
 0x18f   :  { %v158_v59 = vsub.f32 %v154_v58, %v156_v57 }
 0x191   :  { %173 = vperm.xlu1 %232, %v157_v56  }
 0x195   :  { %178 = vperm.xlu1 %232, %v158_v59  }
 0x204   :  { %v162_v60 = vpop.permute.xlu0 %161 }
 0x205   :  { %v169_v62 = vmul.f32 %v162_v60, %v112_v23 }
 0x208   :  { %v167_v61 = vpop.permute.xlu1 %166 }
 0x209   :  { %v170_v1 = vmul.f32 %v167_v61, %v117_v26 }
 0x20c   :  { %v174_v63 = vpop.permute.xlu1 %173 }
 0x20d   :  { %v181_v0 = vadd.f32 %v174_v63, %v169_v62 }
 0x20f   :  { %v183_v2 = vmax.f32 %v181_v0, 0.0 }
 0x210   :  { %v179_v3 = vpop.permute.xlu1 %178 }
 0x211   :  { %185 = vst.msk [vmem:[%s394_s4] sm:$0xff] %vm121_vm1, %v183_v2  ;;  %v182_v4 = vadd.f32 %v179_v3, %v170_v1 }
 0x213   :  { %v184_v5 = vmax.f32 %v182_v4, 0.0 }
 0x215   :  { %186 = vst.msk [vmem:[%s394_s4 + $0x8] sm:$0xff] %vm121_vm1, %v184_v5 }

// kernel: simplify_net_forward.10
= control target key start
LH: loop header
LB: loop body
LE: loop exit
PB: predicated region body
PF: predicated region fallthrough
CT: control target
= control target key end

     0   :  { %vm128_vm0 = vcmask 261120   ;;  %v275_v48 = vmov 0   ;;  %s433_s1 = inlined_call_operand.vmem [shape: f32[256,32], index: 1, kind: input, shape index: {}]   ;;  %s434_s0 = inlined_call_operand.vmem [shape: f32[16,256], index: 0, kind: input, shape index: {}]   ;;  %s435_s2 = inlined_call_operand.vmem [shape: f32[16,1], index: 2, kind: input, shape index: {}]   ;;  %s436_s3 = inlined_call_operand.vmem [shape: f32[16,1], index: 3, kind: input, shape index: {}]   ;;  %s437_s4 = inlined_call_operand.vmem [shape: f32[16,32], index: 4, kind: output, shape index: {}]  }
   0x1   :  { %v52_v0 = vld [vmem:[%s433_s1 + $0xf8] sm:$0xff]  ;;  %v51_v2 = vld [vmem:[%s433_s1 + $0xf0] sm:$0xff]  ;;  %v50_v4 = vld [vmem:[%s433_s1 + $0xe8] sm:$0xff]  ;;  %269 = vset.pattern.permute.xlu0 %v275_v48  ;;  %270 = vset.pattern.permute.xlu1 %v275_v48 }
   0x2   :  { %v36_v1 = vld [vmem:[%s433_s1 + $0x78] sm:$0xff]  ;;  %198 = vmatprep.subr.mxu0 %v52_v0  ;;  %236 = vmatprep.subr.mxu1 %v52_v0  ;;  %v35_v3 = vld [vmem:[%s433_s1 + $0x70] sm:$0xff]  ;;  %v34_v5 = vld [vmem:[%s433_s1 + $0x68] sm:$0xff] }
   0x3   :  { %199 = vmatpush3.msra.mxu0 %v36_v1  ;;  %252 = vmatpush3.msra.mxu1 %v36_v1  ;;  %v49_v6 = vld [vmem:[%s433_s1 + $0xe0] sm:$0xff]  ;;  %v48_v8 = vld [vmem:[%s433_s1 + $0xd8] sm:$0xff]  ;;  %v47_v10 = vld [vmem:[%s433_s1 + $0xd0] sm:$0xff] }
   0x4   :  { %200 = vmatprep.subr.mxu0 %v51_v2  ;;  %237 = vmatprep.subr.mxu1 %v51_v2  ;;  %v33_v7 = vld [vmem:[%s433_s1 + $0x60] sm:$0xff]  ;;  %v32_v9 = vld [vmem:[%s433_s1 + $0x58] sm:$0xff]  ;;  %v31_v11 = vld [vmem:[%s433_s1 + $0x50] sm:$0xff] }
   0x5   :  { %201 = vmatpush3.msra.mxu0 %v35_v3  ;;  %253 = vmatpush3.msra.mxu1 %v35_v3  ;;  %v46_v12 = vld [vmem:[%s433_s1 + $0xc8] sm:$0xff]  ;;  %v45_v14 = vld [vmem:[%s433_s1 + $0xc0] sm:$0xff]  ;;  %v44_v16 = vld [vmem:[%s433_s1 + $0xb8] sm:$0xff] }
   0x6   :  { %202 = vmatprep.subr.mxu0 %v50_v4  ;;  %238 = vmatprep.subr.mxu1 %v50_v4  ;;  %v30_v13 = vld [vmem:[%s433_s1 + $0x48] sm:$0xff]  ;;  %v29_v15 = vld [vmem:[%s433_s1 + $0x40] sm:$0xff]  ;;  %v28_v17 = vld [vmem:[%s433_s1 + $0x38] sm:$0xff] }
   0x7   :  { %203 = vmatpush3.msra.mxu0 %v34_v5  ;;  %254 = vmatpush3.msra.mxu1 %v34_v5  ;;  %v43_v18 = vld [vmem:[%s433_s1 + $0xb0] sm:$0xff]  ;;  %v42_v20 = vld [vmem:[%s433_s1 + $0xa8] sm:$0xff]  ;;  %v41_v22 = vld [vmem:[%s433_s1 + $0xa0] sm:$0xff] }
   0x8   :  { %204 = vmatprep.subr.mxu0 %v49_v6  ;;  %239 = vmatprep.subr.mxu1 %v49_v6  ;;  %v27_v19 = vld [vmem:[%s433_s1 + $0x30] sm:$0xff]  ;;  %v26_v21 = vld [vmem:[%s433_s1 + $0x28] sm:$0xff]  ;;  %v25_v23 = vld [vmem:[%s433_s1 + $0x20] sm:$0xff] }
   0x9   :  { %205 = vmatpush3.msra.mxu0 %v33_v7  ;;  %255 = vmatpush3.msra.mxu1 %v33_v7  ;;  %v40_v24 = vld [vmem:[%s433_s1 + $0x98] sm:$0xff]  ;;  %v39_v26 = vld [vmem:[%s433_s1 + $0x90] sm:$0xff]  ;;  %v38_v28 = vld [vmem:[%s433_s1 + $0x88] sm:$0xff] }
   0xa   :  { %206 = vmatprep.subr.mxu0 %v48_v8  ;;  %240 = vmatprep.subr.mxu1 %v48_v8  ;;  %v24_v25 = vld [vmem:[%s433_s1 + $0x18] sm:$0xff]  ;;  %v23_v27 = vld [vmem:[%s433_s1 + $0x10] sm:$0xff]  ;;  %v22_v29 = vld [vmem:[%s433_s1 + $0x8] sm:$0xff] }
   0xb   :  { %207 = vmatpush3.msra.mxu0 %v32_v9  ;;  %256 = vmatpush3.msra.mxu1 %v32_v9  ;;  %v37_v30 = vld [vmem:[%s433_s1 + $0x80] sm:$0xff]  ;;  %v18_v31 = vld [vmem:[%s434_s0 + $0x8] sm:$0xff]  ;;  %v20_v34 = vld [vmem:[%s434_s0 + $0x18] sm:$0xff] }
   0xc   :  { %208 = vmatprep.subr.mxu0 %v47_v10  ;;  %241 = vmatprep.subr.mxu1 %v47_v10  ;;  %v21_v32 = vld [vmem:[%s433_s1] sm:$0xff]  ;;  %v19_v35 = vld [vmem:[%s434_s0 + $0x10] sm:$0xff]  ;;  %v153_v2 = vld [vmem:[%s435_s2 + $0x8] sm:$0xff] }
   0xd   :  { %209 = vmatpush3.msra.mxu0 %v31_v11  ;;  %257 = vmatpush3.msra.mxu1 %v31_v11  ;;  %v17_v33 = vld [vmem:[%s434_s0] sm:$0xff]  ;;  %v161_v9 = vld [vmem:[%s436_s3 + $0x8] sm:$0xff] }
   0xe   :  { %210 = vmatprep.subr.mxu0 %v46_v12  ;;  %242 = vmatprep.subr.mxu1 %v46_v12  ;;  %v152_v63 = vld [vmem:[%s435_s2] sm:$0xff] }
   0xf   :  { %211 = vmatpush3.msra.mxu0 %v30_v13  ;;  %258 = vmatpush3.msra.mxu1 %v30_v13  ;;  %v160_v6 = vld [vmem:[%s436_s3] sm:$0xff] }
  0x10   :  { %212 = vmatprep.subr.mxu0 %v45_v14  ;;  %243 = vmatprep.subr.mxu1 %v45_v14 }
  0x11   :  { %213 = vmatpush3.msra.mxu0 %v29_v15  ;;  %259 = vmatpush3.msra.mxu1 %v29_v15 }
  0x12   :  { %214 = vmatprep.subr.mxu0 %v44_v16  ;;  %244 = vmatprep.subr.mxu1 %v44_v16 }
  0x13   :  { %215 = vmatpush3.msra.mxu0 %v28_v17  ;;  %260 = vmatpush3.msra.mxu1 %v28_v17 }
  0x14   :  { %216 = vmatprep.subr.mxu0 %v43_v18  ;;  %245 = vmatprep.subr.mxu1 %v43_v18 }
  0x15   :  { %217 = vmatpush3.msra.mxu0 %v27_v19  ;;  %261 = vmatpush3.msra.mxu1 %v27_v19 }
  0x16   :  { %218 = vmatprep.subr.mxu0 %v42_v20  ;;  %246 = vmatprep.subr.mxu1 %v42_v20 }
  0x17   :  { %219 = vmatpush3.msra.mxu0 %v26_v21  ;;  %262 = vmatpush3.msra.mxu1 %v26_v21 }
  0x18   :  { %220 = vmatprep.subr.mxu0 %v41_v22  ;;  %247 = vmatprep.subr.mxu1 %v41_v22 }
  0x19   :  { %221 = vmatpush3.msra.mxu0 %v25_v23  ;;  %263 = vmatpush3.msra.mxu1 %v25_v23 }
  0x1a   :  { %222 = vmatprep.subr.mxu0 %v40_v24  ;;  %248 = vmatprep.subr.mxu1 %v40_v24 }
  0x1b   :  { %223 = vmatpush3.msra.mxu0 %v24_v25  ;;  %264 = vmatpush3.msra.mxu1 %v24_v25 }
  0x1c   :  { %224 = vmatprep.subr.mxu0 %v39_v26  ;;  %249 = vmatprep.subr.mxu1 %v39_v26 }
  0x1d   :  { %225 = vmatpush3.msra.mxu0 %v23_v27  ;;  %265 = vmatpush3.msra.mxu1 %v23_v27 }
  0x1e   :  { %226 = vmatprep.subr.mxu0 %v38_v28  ;;  %250 = vmatprep.subr.mxu1 %v38_v28 }
  0x1f   :  { %227 = vmatpush3.msra.mxu0 %v22_v29  ;;  %266 = vmatpush3.msra.mxu1 %v22_v29 }
  0x20   :  { %228 = vmatprep.subr.mxu0 %v37_v30  ;;  %117 = vmatprep.mubr.f32.mxu0 %v18_v31 }
  0x21   :  { %229 = vmatpush3.msra.mxu0 %v21_v32  ;;  %251 = vmatprep.subr.mxu1 %v37_v30 }
  0x22   :  { %118 = vmatmul.mubr.f32.vlgmr.msra.gmra.mxu0 %v17_v33  ;;  %267 = vmatpush3.msra.mxu1 %v21_v32 }
  0x23   :  { %122 = vmatprep.mubr.f32.mxu1 %v20_v34 }
  0x24   :  { %123 = vmatmul.mubr.f32.vlgmr.msra.gmra.mxu1 %v19_v35 }
  0xe2   :  { %v230_v36 = vpop.f32.mrf.mxu0 }
  0xe4   :  { %v231_v37 = vpop.f32.mrf.mxu0  ;;  %v233_v38 = vpop.f32.mrf.mxu1 }
  0xe5   :  { %v232_v39 = vadd.f32 %v231_v37, %v230_v36 }
  0xe6   :  { %v234_v40 = vpop.f32.mrf.mxu1 }
  0xe7   :  { %v235_v41 = vadd.f32 %v234_v40, %v233_v38  ;;  %v129_v42 = vsel %vm128_vm0, %v232_v39, 0.0  ;;  %v138_v43 = vmul.f32 %v232_v39, %v232_v39 }
  0xe8   :  { %130 = vadd.xlane.f32.xlu0 %v129_v42 }
  0xe9   :  { %v140_v44 = vsel %vm128_vm0, %v138_v43, 0.0  ;;  %v139_v45 = vmul.f32 %v235_v41, %v235_v41  ;;  %v132_v46 = vsel %vm128_vm0, %v235_v41, 0.0 }
  0xea   :  { %141 = vadd.xlane.f32.xlu1 %v140_v44 }
  0xeb   :  { %v143_v47 = vsel %vm128_vm0, %v139_v45, 0.0 }
  0xec   :  { %133 = vadd.xlane.f32.xlu0 %v132_v46 }
  0xee   :  { %144 = vadd.xlane.f32.xlu1 %v143_v47 }
 0x171   :  { %v131_v49 = vpop.xlane.xlu0 %130 }
 0x172   :  { %v136_v50 = vmul.f32 0.03125, %v131_v49 }
 0x173   :  { %v142_v51 = vpop.xlane.xlu1 %141 }
 0x174   :  { %v148_v52 = vmul.f32 %v136_v50, %v136_v50  ;;  %v146_v53 = vmul.f32 0.03125, %v142_v51 }
 0x175   :  { %v134_v54 = vpop.xlane.xlu0 %133 }
 0x176   :  { %v150_v55 = vsub.f32 %v146_v53, %v148_v52  ;;  %v137_v56 = vmul.f32 0.03125, %v134_v54 }
 0x177   :  { %v145_v57 = vpop.xlane.xlu1 %144 }
 0x178   :  { %v154_v58 = vadd.f32 1e-05, %v150_v55  ;;  %v149_v59 = vmul.f32 %v137_v56, %v137_v56  ;;  %v147_v60 = vmul.f32 0.03125, %v145_v57 }
 0x17a   :  { %271 = vrsqrt.f32 %v154_v58  ;;  %v151_v61 = vsub.f32 %v147_v60, %v149_v59 }
 0x17c   :  { %v155_v62 = vadd.f32 1e-05, %v151_v61 }
 0x17e   :  { %273 = vrsqrt.f32 %v155_v62 }
 0x187   :  { %v272_v0 = vpop.eup %271 }
 0x188   :  { %v158_v1 = vmul.f32 %v272_v0, %v152_v63 }
 0x18a   :  { %168 = vperm.xlu0 %269, %v158_v1   ;;  %v162_v5 = vmul.f32 %v158_v1, %v136_v50 }
 0x18b   :  { %v274_v3 = vpop.eup %273 }
 0x18c   :  { %v159_v4 = vmul.f32 %v274_v3, %v153_v2  ;;  %v164_v7 = vsub.f32 %v160_v6, %v162_v5 }
 0x18e   :  { %173 = vperm.xlu1 %270, %v159_v4   ;;  %v163_v8 = vmul.f32 %v159_v4, %v137_v56 }
 0x190   :  { %v165_v10 = vsub.f32 %v161_v9, %v163_v8 }
 0x192   :  { %180 = vperm.xlu1 %270, %v164_v7  }
 0x196   :  { %185 = vperm.xlu1 %270, %v165_v10  }
 0x205   :  { %v169_v11 = vpop.permute.xlu0 %168 }
 0x206   :  { %v176_v13 = vmul.f32 %v232_v39, %v169_v11 }
 0x209   :  { %v174_v12 = vpop.permute.xlu1 %173 }
 0x20a   :  { %v177_v16 = vmul.f32 %v235_v41, %v174_v12 }
 0x20d   :  { %v181_v14 = vpop.permute.xlu1 %180 }
 0x20e   :  { %v188_v15 = vadd.f32 %v181_v14, %v176_v13 }
 0x210   :  { %v190_v17 = vmax.f32 %v188_v15, 0.0 }
 0x211   :  { %v186_v18 = vpop.permute.xlu1 %185 }
 0x212   :  { %192 = vst.msk [vmem:[%s437_s4] sm:$0xff] %vm128_vm0, %v190_v17  ;;  %v189_v19 = vadd.f32 %v186_v18, %v177_v16 }
 0x214   :  { %v191_v20 = vmax.f32 %v189_v19, 0.0 }
 0x216   :  { %193 = vst.msk [vmem:[%s437_s4 + $0x8] sm:$0xff] %vm128_vm0, %v191_v20 }

// kernel: simplify_net_forward.11
= control target key start
LH: loop header
LB: loop body
LE: loop exit
PB: predicated region body
PF: predicated region fallthrough
CT: control target
= control target key end

     0   :  { %s647_s1 = inlined_call_operand.vmem [shape: f32[512,128], index: 1, kind: input, shape index: {}]   ;;  %s648_s0 = inlined_call_operand.vmem [shape: f32[16,512], index: 0, kind: input, shape index: {}]   ;;  %s649_s2 = inlined_call_operand.vmem [shape: f32[16,1], index: 2, kind: input, shape index: {}]   ;;  %s650_s3 = inlined_call_operand.vmem [shape: f32[16,1], index: 3, kind: input, shape index: {}]   ;;  %s651_s4 = inlined_call_operand.vmem [shape: f32[16,128], index: 4, kind: output, shape index: {}]  }
   0x1   :  { %v56_v0 = vld [vmem:[%s647_s1 + $0xf8] sm:$0xff]  ;;  %v55_v4 = vld [vmem:[%s647_s1 + $0xf0] sm:$0xff]  ;;  %v54_v8 = vld [vmem:[%s647_s1 + $0xe8] sm:$0xff] }
   0x2   :  { %v88_v1 = vld [vmem:[%s647_s1 + $0x1f8] sm:$0xff]  ;;  %304 = vmatprep.subr.mxu0 %v56_v0  ;;  %v87_v5 = vld [vmem:[%s647_s1 + $0x1f0] sm:$0xff]  ;;  %v86_v9 = vld [vmem:[%s647_s1 + $0x1e8] sm:$0xff] }
   0x3   :  { %v40_v2 = vld [vmem:[%s647_s1 + $0x78] sm:$0xff]  ;;  %342 = vmatprep.subr.mxu1 %v88_v1  ;;  %v39_v6 = vld [vmem:[%s647_s1 + $0x70] sm:$0xff]  ;;  %v38_v10 = vld [vmem:[%s647_s1 + $0x68] sm:$0xff] }
   0x4   :  { %v72_v3 = vld [vmem:[%s647_s1 + $0x178] sm:$0xff]  ;;  %305 = vmatpush3.msra.mxu0 %v40_v2  ;;  %v71_v7 = vld [vmem:[%s647_s1 + $0x170] sm:$0xff]  ;;  %v70_v11 = vld [vmem:[%s647_s1 + $0x168] sm:$0xff] }
   0x5   :  { %343 = vmatpush3.msra.mxu1 %v72_v3  ;;  %306 = vmatprep.subr.mxu0 %v55_v4  ;;  %v53_v12 = vld [vmem:[%s647_s1 + $0xe0] sm:$0xff]  ;;  %v52_v16 = vld [vmem:[%s647_s1 + $0xd8] sm:$0xff]  ;;  %v51_v20 = vld [vmem:[%s647_s1 + $0xd0] sm:$0xff] }
   0x6   :  { %344 = vmatprep.subr.mxu1 %v87_v5  ;;  %307 = vmatpush3.msra.mxu0 %v39_v6  ;;  %v85_v13 = vld [vmem:[%s647_s1 + $0x1e0] sm:$0xff]  ;;  %v84_v17 = vld [vmem:[%s647_s1 + $0x1d8] sm:$0xff]  ;;  %v83_v21 = vld [vmem:[%s647_s1 + $0x1d0] sm:$0xff] }
   0x7   :  { %345 = vmatpush3.msra.mxu1 %v71_v7  ;;  %308 = vmatprep.subr.mxu0 %v54_v8  ;;  %v37_v14 = vld [vmem:[%s647_s1 + $0x60] sm:$0xff]  ;;  %v36_v18 = vld [vmem:[%s647_s1 + $0x58] sm:$0xff]  ;;  %v35_v22 = vld [vmem:[%s647_s1 + $0x50] sm:$0xff] }
   0x8   :  { %346 = vmatprep.subr.mxu1 %v86_v9  ;;  %v69_v15 = vld [vmem:[%s647_s1 + $0x160] sm:$0xff]  ;;  %309 = vmatpush3.msra.mxu0 %v38_v10  ;;  %v68_v19 = vld [vmem:[%s647_s1 + $0x158] sm:$0xff]  ;;  %v67_v23 = vld [vmem:[%s647_s1 + $0x150] sm:$0xff] }
   0x9   :  { %347 = vmatpush3.msra.mxu1 %v70_v11  ;;  %310 = vmatprep.subr.mxu0 %v53_v12  ;;  %v50_v24 = vld [vmem:[%s647_s1 + $0xc8] sm:$0xff]  ;;  %v49_v28 = vld [vmem:[%s647_s1 + $0xc0] sm:$0xff]  ;;  %v48_v32 = vld [vmem:[%s647_s1 + $0xb8] sm:$0xff] }
   0xa   :  { %348 = vmatprep.subr.mxu1 %v85_v13  ;;  %311 = vmatpush3.msra.mxu0 %v37_v14  ;;  %v82_v25 = vld [vmem:[%s647_s1 + $0x1c8] sm:$0xff]  ;;  %v81_v29 = vld [vmem:[%s647_s1 + $0x1c0] sm:$0xff]  ;;  %v80_v33 = vld [vmem:[%s647_s1 + $0x1b8] sm:$0xff] }
   0xb   :  { %349 = vmatpush3.msra.mxu1 %v69_v15  ;;  %312 = vmatprep.subr.mxu0 %v52_v16  ;;  %v34_v26 = vld [vmem:[%s647_s1 + $0x48] sm:$0xff]  ;;  %v33_v30 = vld [vmem:[%s647_s1 + $0x40] sm:$0xff]  ;;  %v32_v34 = vld [vmem:[%s647_s1 + $0x38] sm:$0xff] }
   0xc   :  { %350 = vmatprep.subr.mxu1 %v84_v17  ;;  %313 = vmatpush3.msra.mxu0 %v36_v18  ;;  %v66_v27 = vld [vmem:[%s647_s1 + $0x148] sm:$0xff]  ;;  %v65_v31 = vld [vmem:[%s647_s1 + $0x140] sm:$0xff]  ;;  %v64_v35 = vld [vmem:[%s647_s1 + $0x138] sm:$0xff] }
   0xd   :  { %351 = vmatpush3.msra.mxu1 %v68_v19  ;;  %314 = vmatprep.subr.mxu0 %v51_v20  ;;  %v47_v36 = vld [vmem:[%s647_s1 + $0xb0] sm:$0xff]  ;;  %v46_v40 = vld [vmem:[%s647_s1 + $0xa8] sm:$0xff]  ;;  %v45_v44 = vld [vmem:[%s647_s1 + $0xa0] sm:$0xff] }
   0xe   :  { %352 = vmatprep.subr.mxu1 %v83_v21  ;;  %315 = vmatpush3.msra.mxu0 %v35_v22  ;;  %v79_v37 = vld [vmem:[%s647_s1 + $0x1b0] sm:$0xff]  ;;  %v78_v41 = vld [vmem:[%s647_s1 + $0x1a8] sm:$0xff]  ;;  %v77_v45 = vld [vmem:[%s647_s1 + $0x1a0] sm:$0xff] }
   0xf   :  { %353 = vmatpush3.msra.mxu1 %v67_v23  ;;  %316 = vmatprep.subr.mxu0 %v50_v24  ;;  %v31_v38 = vld [vmem:[%s647_s1 + $0x30] sm:$0xff]  ;;  %v30_v42 = vld [vmem:[%s647_s1 + $0x28] sm:$0xff]  ;;  %v29_v46 = vld [vmem:[%s647_s1 + $0x20] sm:$0xff]  ;;  %v387_v24 = vmov 0  }
  0x10   :  { %354 = vmatprep.subr.mxu1 %v82_v25  ;;  %317 = vmatpush3.msra.mxu0 %v34_v26  ;;  %v63_v39 = vld [vmem:[%s647_s1 + $0x130] sm:$0xff]  ;;  %v62_v43 = vld [vmem:[%s647_s1 + $0x128] sm:$0xff]  ;;  %v61_v47 = vld [vmem:[%s647_s1 + $0x120] sm:$0xff] }
  0x11   :  { %355 = vmatpush3.msra.mxu1 %v66_v27  ;;  %318 = vmatprep.subr.mxu0 %v49_v28  ;;  %v44_v48 = vld [vmem:[%s647_s1 + $0x98] sm:$0xff]  ;;  %v43_v52 = vld [vmem:[%s647_s1 + $0x90] sm:$0xff]  ;;  %v42_v56 = vld [vmem:[%s647_s1 + $0x88] sm:$0xff] }
  0x12   :  { %356 = vmatprep.subr.mxu1 %v81_v29  ;;  %319 = vmatpush3.msra.mxu0 %v33_v30  ;;  %v76_v49 = vld [vmem:[%s647_s1 + $0x198] sm:$0xff]  ;;  %v75_v53 = vld [vmem:[%s647_s1 + $0x190] sm:$0xff]  ;;  %v74_v57 = vld [vmem:[%s647_s1 + $0x188] sm:$0xff] }
  0x13   :  { %357 = vmatpush3.msra.mxu1 %v65_v31  ;;  %320 = vmatprep.subr.mxu0 %v48_v32  ;;  %v28_v50 = vld [vmem:[%s647_s1 + $0x18] sm:$0xff]  ;;  %v27_v54 = vld [vmem:[%s647_s1 + $0x10] sm:$0xff]  ;;  %v26_v58 = vld [vmem:[%s647_s1 + $0x8] sm:$0xff] }
  0x14   :  { %358 = vmatprep.subr.mxu1 %v80_v33  ;;  %321 = vmatpush3.msra.mxu0 %v32_v34  ;;  %v60_v51 = vld [vmem:[%s647_s1 + $0x118] sm:$0xff]  ;;  %v59_v55 = vld [vmem:[%s647_s1 + $0x110] sm:$0xff]  ;;  %v58_v59 = vld [vmem:[%s647_s1 + $0x108] sm:$0xff] }
  0x15   :  { %359 = vmatpush3.msra.mxu1 %v64_v35  ;;  %322 = vmatprep.subr.mxu0 %v47_v36  ;;  %v41_v60 = vld [vmem:[%s647_s1 + $0x80] sm:$0xff]  ;;  %v18_v63 = vld [vmem:[%s648_s0 + $0x8] sm:$0xff]  ;;  %v20_v1 = vld [vmem:[%s648_s0 + $0x18] sm:$0xff] }
  0x16   :  { %360 = vmatprep.subr.mxu1 %v79_v37  ;;  %323 = vmatpush3.msra.mxu0 %v31_v38  ;;  %v73_v61 = vld [vmem:[%s647_s1 + $0x180] sm:$0xff]  ;;  %v19_v3 = vld [vmem:[%s648_s0 + $0x10] sm:$0xff]  ;;  %v22_v4 = vld [vmem:[%s648_s0 + $0x28] sm:$0xff] }
  0x17   :  { %361 = vmatpush3.msra.mxu1 %v63_v39  ;;  %324 = vmatprep.subr.mxu0 %v46_v40  ;;  %v25_v62 = vld [vmem:[%s647_s1] sm:$0xff]  ;;  %v24_v5 = vld [vmem:[%s648_s0 + $0x38] sm:$0xff]  ;;  %v23_v7 = vld [vmem:[%s648_s0 + $0x30] sm:$0xff] }
  0x18   :  { %362 = vmatprep.subr.mxu1 %v78_v41  ;;  %325 = vmatpush3.msra.mxu0 %v30_v42  ;;  %v57_v0 = vld [vmem:[%s647_s1 + $0x100] sm:$0xff]  ;;  %v259_v42 = vld [vmem:[%s649_s2 + $0x8] sm:$0xff] }
  0x19   :  { %363 = vmatpush3.msra.mxu1 %v62_v43  ;;  %326 = vmatprep.subr.mxu0 %v45_v44  ;;  %v17_v2 = vld [vmem:[%s648_s0] sm:$0xff] }
  0x1a   :  { %364 = vmatprep.subr.mxu1 %v77_v45  ;;  %327 = vmatpush3.msra.mxu0 %v29_v46  ;;  %v21_v6 = vld [vmem:[%s648_s0 + $0x20] sm:$0xff] }
  0x1b   :  { %365 = vmatpush3.msra.mxu1 %v61_v47  ;;  %328 = vmatprep.subr.mxu0 %v44_v48  ;;  %v258_v39 = vld [vmem:[%s649_s2] sm:$0xff] }
  0x1c   :  { %366 = vmatprep.subr.mxu1 %v76_v49  ;;  %329 = vmatpush3.msra.mxu0 %v28_v50  ;;  %v266_v46 = vld [vmem:[%s650_s3] sm:$0xff]  ;;  %v267_v49 = vld [vmem:[%s650_s3 + $0x8] sm:$0xff] }
  0x1d   :  { %367 = vmatpush3.msra.mxu1 %v60_v51  ;;  %330 = vmatprep.subr.mxu0 %v43_v52 }
  0x1e   :  { %368 = vmatprep.subr.mxu1 %v75_v53  ;;  %331 = vmatpush3.msra.mxu0 %v27_v54 }
  0x1f   :  { %369 = vmatpush3.msra.mxu1 %v59_v55  ;;  %332 = vmatprep.subr.mxu0 %v42_v56 }
  0x20   :  { %370 = vmatprep.subr.mxu1 %v74_v57  ;;  %333 = vmatpush3.msra.mxu0 %v26_v58 }
  0x21   :  { %371 = vmatpush3.msra.mxu1 %v58_v59  ;;  %334 = vmatprep.subr.mxu0 %v41_v60 }
  0x22   :  { %372 = vmatprep.subr.mxu1 %v73_v61  ;;  %335 = vmatpush3.msra.mxu0 %v25_v62 }
  0x23   :  { %153 = vmatprep.mubr.f32.mxu0 %v18_v63  ;;  %373 = vmatpush3.msra.mxu1 %v57_v0 }
  0x24   :  { %228 = vmatprep.mubr.f32.mxu1 %v20_v1  ;;  %154 = vmatmul.mubr.f32.vlgmr.msra.gmra.mxu0 %v17_v2 }
  0x25   :  { %229 = vmatmul.mubr.f32.vlgmr.msra.gmra.mxu1 %v19_v3  ;;  %158 = vmatprep.mubr.f32.mxu0 %v22_v4 }
  0x26   :  { %233 = vmatprep.mubr.f32.mxu1 %v24_v5  ;;  %381 = vset.pattern.permute.xlu0 %v387_v24 }
  0x27   :  { %382 = vset.pattern.permute.xlu1 %v387_v24 }
  0x28   :  { %159 = vmatmul.mubr.f32.gmra.mxu0 %v21_v6 }
  0x29   :  { %234 = vmatmul.mubr.f32.gmra.mxu1 %v23_v7 }
  0xe4   :  { %v336_v8 = vpop.f32.mrf.mxu0 }
  0xe5   :  { %v374_v9 = vpop.f32.mrf.mxu1 }
  0xe6   :  { %v337_v10 = vpop.f32.mrf.mxu0 }
  0xe7   :  { %v375_v11 = vpop.f32.mrf.mxu1  ;;  %v338_v12 = vadd.f32 %v337_v10, %v336_v8 }
  0xe8   :  { %v376_v13 = vadd.f32 %v375_v11, %v374_v9  ;;  %v339_v14 = vpop.f32.mrf.mxu0 }
  0xe9   :  { %v377_v15 = vpop.f32.mrf.mxu1 }
  0xea   :  { %v231_v16 = vadd.f32 %v376_v13, %v338_v12  ;;  %v340_v17 = vpop.f32.mrf.mxu0 }
  0xeb   :  { %v378_v18 = vpop.f32.mrf.mxu1  ;;  %v341_v19 = vadd.f32 %v340_v17, %v339_v14 }
  0xec   :  { %v379_v20 = vadd.f32 %v378_v18, %v377_v15  ;;  %239 = vadd.xlane.f32.xlu0 %v231_v16  ;;  %v246_v21 = vmul.f32 %v231_v16, %v231_v16 }
  0xee   :  { %v236_v22 = vadd.f32 %v379_v20, %v341_v19  ;;  %248 = vadd.xlane.f32.xlu1 %v246_v21 }
  0xf0   :  { %241 = vadd.xlane.f32.xlu0 %v236_v22  ;;  %v247_v23 = vmul.f32 %v236_v22, %v236_v22 }
  0xf2   :  { %250 = vadd.xlane.f32.xlu1 %v247_v23 }
 0x175   :  { %v240_v25 = vpop.xlane.xlu0 %239 }
 0x176   :  { %v244_v26 = vmul.f32 0.0078125, %v240_v25 }
 0x177   :  { %v249_v27 = vpop.xlane.xlu1 %248 }
 0x178   :  { %v254_v28 = vmul.f32 %v244_v26, %v244_v26  ;;  %v252_v29 = vmul.f32 0.0078125, %v249_v27 }
 0x179   :  { %v242_v30 = vpop.xlane.xlu0 %241 }
 0x17a   :  { %v256_v31 = vsub.f32 %v252_v29, %v254_v28  ;;  %v245_v32 = vmul.f32 0.0078125, %v242_v30 }
 0x17b   :  { %v251_v33 = vpop.xlane.xlu1 %250 }
 0x17c   :  { %v260_v34 = vadd.f32 1e-05, %v256_v31  ;;  %v255_v35 = vmul.f32 %v245_v32, %v245_v32  ;;  %v253_v36 = vmul.f32 0.0078125, %v251_v33 }
 0x17e   :  { %383 = vrsqrt.f32 %v260_v34  ;;  %v257_v37 = vsub.f32 %v253_v36, %v255_v35 }
 0x180   :  { %v261_v38 = vadd.f32 1e-05, %v257_v37 }
 0x182   :  { %385 = vrsqrt.f32 %v261_v38 }
 0x18b   :  { %v384_v40 = vpop.eup %383 }
 0x18c   :  { %v264_v41 = vmul.f32 %v384_v40, %v258_v39 }
 0x18e   :  { %274 = vperm.xlu0 %381, %v264_v41   ;;  %v268_v45 = vmul.f32 %v264_v41, %v244_v26 }
 0x18f   :  { %v386_v43 = vpop.eup %385 }
 0x190   :  { %v265_v44 = vmul.f32 %v386_v43, %v259_v42  ;;  %v270_v47 = vsub.f32 %v266_v46, %v268_v45 }
 0x192   :  { %279 = vperm.xlu1 %382, %v265_v44   ;;  %v269_v48 = vmul.f32 %v265_v44, %v245_v32 }
 0x194   :  { %v271_v50 = vsub.f32 %v267_v49, %v269_v48 }
 0x196   :  { %286 = vperm.xlu1 %382, %v270_v47  }
 0x19a   :  { %291 = vperm.xlu1 %382, %v271_v50  }
 0x209   :  { %v275_v51 = vpop.permute.xlu0 %274 }
 0x20a   :  { %v282_v53 = vmul.f32 %v275_v51, %v231_v16 }
 0x20d   :  { %v280_v52 = vpop.permute.xlu1 %279 }
 0x20e   :  { %v283_v56 = vmul.f32 %v280_v52, %v236_v22 }
 0x211   :  { %v287_v54 = vpop.permute.xlu1 %286 }
 0x212   :  { %v294_v55 = vadd.f32 %v287_v54, %v282_v53 }
 0x214   :  { %v296_v57 = vmax.f32 %v294_v55, 0.0 }
 0x215   :  { %v292_v58 = vpop.permute.xlu1 %291 }
 0x216   :  { %298 = vst [vmem:[%s651_s4] sm:$0xff] %v296_v57  ;;  %v295_v59 = vadd.f32 %v292_v58, %v283_v56 }
 0x218   :  { %v297_v60 = vmax.f32 %v295_v59, 0.0 }
 0x21a   :  { %299 = vst [vmem:[%s651_s4 + $0x8] sm:$0xff] %v297_v60 }

// kernel: simplify_net_forward.12
= control target key start
LH: loop header
LB: loop body
LE: loop exit
PB: predicated region body
PF: predicated region fallthrough
CT: control target
= control target key end

     0   :  { %v125_v0 = vmov 0.0   ;;  %vm126_vm0 = vmmov 0   ;;  %v127_v3 = vmov 0   ;;  %vm25_vm1 = vcmask 261120   ;;  %s169_s1 = inlined_call_operand.vmem [shape: f32[32,128], index: 1, kind: input, shape index: {}]   ;;  %s170_s2 = inlined_call_operand.vmem [shape: f32[2,1], index: 2, kind: input, shape index: {}]   ;;  %s171_s0 = inlined_call_operand.vmem [shape: f32[2,32], index: 0, kind: input, shape index: {}]   ;;  %s172_s3 = inlined_call_operand.vmem [shape: f32[2,128], index: 3, kind: output, shape index: {}]  }
   0x1   :  { %110 = vmatprep.subr.mxu0 %v125_v0  ;;  %v18_v1 = vld [vmem:[%s169_s1 + $0x18] sm:$0xff]  ;;  %v17_v2 = vld [vmem:[%s169_s1 + $0x10] sm:$0xff]  ;;  %118 = vmatprep.mubr.msk.f32.mxu0 %vm126_vm0, %v125_v0  ;;  %v19_v4 = vld [vmem:[%s170_s2] sm:$0x3] }
   0x2   :  { %111 = vmatpush3.msra.mxu0 %v18_v1  ;;  %124 = vset.pattern.permute.xlu0 %v127_v3  ;;  %v16_v5 = vld [vmem:[%s169_s1 + $0x8] sm:$0xff]  ;;  %v15_v6 = vld [vmem:[%s169_s1] sm:$0xff] }
   0x3   :  { %112 = vmatprep.subr.mxu0 %v125_v0  ;;  %22 = vperm.xlu0 %124, %v19_v4   ;;  %v14_v7 = vld [vmem:[%s171_s0] sm:$0x3] }
   0x4   :  { %113 = vmatpush3.msra.mxu0 %v17_v2 }
   0x5   :  { %114 = vmatprep.subr.mxu0 %v125_v0 }
   0x6   :  { %115 = vmatpush3.msra.mxu0 %v16_v5 }
   0x7   :  { %116 = vmatprep.subr.mxu0 %v125_v0 }
   0x8   :  { %117 = vmatpush3.msra.mxu0 %v15_v6 }
   0x9   :  { %119 = vmatmul.mubr.msk.f32.vlgmr.msra.gmra.mxu0 %vm25_vm1, %v14_v7 }
  0x7e   :  { %v23_v8 = vpop.permute.xlu0 %22 }
  0xc9   :  { %v95_v9 = vpop.f32.mrf.mxu0 }
  0xca   :  { %v96_v10 = vadd.f32 %v95_v9, %v23_v8 }
  0xcb   :  { %v120_v11 = vpop.f32.mrf.mxu0 }
  0xcc   :  { %99 = vst [vmem:[%s172_s3] sm:$0x3] %v96_v10 }

// kernel: simplify_net_forward.13
= control target key start
LH: loop header
LB: loop body
LE: loop exit
PB: predicated region body
PF: predicated region fallthrough
CT: control target
= control target key end

     0   :  { %vm19_vm0 = vcmask 64512   ;;  %s863_s0 = inlined_call_operand.vmem [shape: f32[16,8], index: 0, kind: input, shape index: {}]   ;;  %s864_s1 = inlined_call_operand.vmem [shape: f32[8,16], index: 1, kind: input, shape index: {}]   ;;  %s865_s2 = inlined_call_operand.vmem [shape: f32[4,8,8], index: 2, kind: input, shape index: {}]   ;;  %s866_s3 = inlined_call_operand.hbm [shape: f32[4,16,16], index: 3, kind: output, shape index: {}]  }
   0x1   :  { %v18_v0 = vld [vmem:[%s865_s2] sm:$0xff]  ;;  %v16_v2 = vld [vmem:[%s863_s0 + $0x8] sm:$0xff]  ;;  %v693_v4 = vld [vmem:[%s865_s2 + $0x10] sm:$0xff] }
   0x2   :  { %v15_v1 = vld [vmem:[%s863_s0] sm:$0xff]  ;;  %727 = vmatprep.subr.mxu0 %v18_v0  ;;  %v688_v3 = vld [vmem:[%s865_s2 + $0x8] sm:$0xff] }
   0x3   :  { %729 = vmatprep.mubr.msk.f32.mxu0 %vm19_vm0, %v15_v1  ;;  %728 = vmatpush3.msra.mxu0 %v18_v0 }
   0x4   :  { %8 = vsyncpa [#allocation3], 0  ;;  %730 = vmatmul.mubr.msk.f32.vlgmr.msra.gmra.mxu0 %vm19_vm0, %v16_v2  ;;  %737 = vmatprep.subr.mxu0 %v688_v3  ;;  %v698_v5 = vld [vmem:[%s865_s2 + $0x18] sm:$0xff]  ;;  %v17_v6 = vld [vmem:[%s864_s1] sm:$0xff]  ;;  %vm182_vm1 = vcmask 130048   ;;  %s792_s1 = smov [#allocation2]  }
   0x5   :  { %738 = vmatpush3.msra.mxu0 %v688_v3  ;;  %739 = vmatprep.mubr.msk.f32.mxu0 %vm19_vm0, %v15_v1  ;;  %s673_s2 = sshll.u32 %s792_s1, 4  ;;  %s674_s2 = int_to_ptr.vmem [resolvable:$true] %s673_s2 }
   0x6   :  { %747 = vmatprep.subr.mxu0 %v693_v4  ;;  %732 = vmatprep.subr.mxu1 %v17_v6  ;;  %s770_s25 = scalar_lea.vmem %s674_s2, 1024  ;;  %p775_p1 = scmp.lt.s32.totalorder %s674_s2, %s674_s2 }
   0x7   :  { %733 = vmatpush3.msra.mxu1 %v17_v6  ;;  %p771_p0 = scmp.ne.s32.totalorder %s674_s2, %s770_s25  ;;  %p776_p2 = scmp.lt.s32.totalorder %s770_s25, %s770_s25 }
   0x8   :  { %740 = vmatmul.mubr.msk.f32.vlgmr.msra.gmra.mxu0 %vm19_vm0, %v16_v2  ;;  %742 = vmatprep.subr.mxu1 %v17_v6 }
   0x9   :  { %748 = vmatpush3.msra.mxu0 %v693_v4  ;;  %749 = vmatprep.mubr.msk.f32.mxu0 %vm19_vm0, %v15_v1  ;;  %p777_p3 = por %p776_p2, %p775_p1 }
   0xa   :  { %757 = vmatprep.subr.mxu0 %v698_v5 }
   0xb   :  { %p778_p4 = pnand %p777_p3, %p771_p0 }
   0xc   :  { %750 = vmatmul.mubr.msk.f32.vlgmr.msra.gmra.mxu0 %vm19_vm0, %v16_v2 }
   0xd   :  { %758 = vmatpush3.msra.mxu0 %v698_v5  ;;  %759 = vmatprep.mubr.msk.f32.mxu0 %vm19_vm0, %v15_v1 }
  0x10   :  { %760 = vmatmul.mubr.msk.f32.vlgmr.msra.gmra.mxu0 %vm19_vm0, %v16_v2 }
  0xc4   :  { %v731_v7 = vpop.f32.mrf.mxu0 }
  0xc6   :  { %v92_v8 = vpop.f32.mrf.mxu0 }
  0xc7   :  { %734 = vmatprep.mubr.msk.f32.mxu1 %vm19_vm0, %v92_v8 }
  0xc8   :  { %735 = vmatmul.mubr.msk.f32.vlgmr.msra.gmra.mxu1 %vm19_vm0, %v731_v7  ;;  %v741_v9 = vpop.f32.mrf.mxu0 }
  0xc9   :  { %743 = vmatpush3.msra.mxu1 %v17_v6 }
  0xca   :  { %v253_v10 = vpop.f32.mrf.mxu0  ;;  %752 = vmatprep.subr.mxu1 %v17_v6 }
  0xcb   :  { %744 = vmatprep.mubr.msk.f32.mxu1 %vm19_vm0, %v253_v10 }
  0xcc   :  { %745 = vmatmul.mubr.msk.f32.vlgmr.msra.gmra.mxu1 %vm19_vm0, %v741_v9  ;;  %v751_v11 = vpop.f32.mrf.mxu0 }
  0xcd   :  { %753 = vmatpush3.msra.mxu1 %v17_v6 }
  0xce   :  { %v414_v12 = vpop.f32.mrf.mxu0  ;;  %762 = vmatprep.subr.mxu1 %v17_v6 }
  0xcf   :  { %754 = vmatprep.mubr.msk.f32.mxu1 %vm19_vm0, %v414_v12 }
  0xd0   :  { %755 = vmatmul.mubr.msk.f32.vlgmr.msra.gmra.mxu1 %vm19_vm0, %v751_v11  ;;  %v761_v13 = vpop.f32.mrf.mxu0 }
  0xd1   :  { %763 = vmatpush3.msra.mxu1 %v17_v6 }
  0xd2   :  { %v575_v14 = vpop.f32.mrf.mxu0 }
  0xd3   :  { %764 = vmatprep.mubr.msk.f32.mxu1 %vm19_vm0, %v575_v14 }
  0xd4   :  { %765 = vmatmul.mubr.msk.f32.vlgmr.msra.gmra.mxu1 %vm19_vm0, %v761_v13 }
 0x188   :  { %v736_v15 = vpop.f32.mrf.mxu1 }
 0x189   :  { %184 = vst.msk [vmem:[#allocation2 + $0x8] sm:$0xff] %vm182_vm1, %v736_v15 }
 0x18a   :  { %v173_v16 = vpop.f32.mrf.mxu1 }
 0x18b   :  { %183 = vst.msk [vmem:[#allocation2] sm:$0xff] %vm182_vm1, %v173_v16 }
 0x18c   :  { %v746_v17 = vpop.f32.mrf.mxu1 }
 0x18d   :  { %345 = vst.msk [vmem:[#allocation2 + $0x18] sm:$0xff] %vm182_vm1, %v746_v17 }
 0x18e   :  { %v334_v18 = vpop.f32.mrf.mxu1 }
 0x18f   :  { %344 = vst.msk [vmem:[#allocation2 + $0x10] sm:$0xff] %vm182_vm1, %v334_v18 }
 0x190   :  { %v756_v19 = vpop.f32.mrf.mxu1 }
 0x191   :  { %506 = vst.msk [vmem:[#allocation2 + $0x28] sm:$0xff] %vm182_vm1, %v756_v19 }
 0x192   :  { %v495_v20 = vpop.f32.mrf.mxu1 }
 0x193   :  { %505 = vst.msk [vmem:[#allocation2 + $0x20] sm:$0xff] %vm182_vm1, %v495_v20 }
 0x194   :  { %v766_v21 = vpop.f32.mrf.mxu1 }
 0x195   :  { %667 = vst.msk [vmem:[#allocation2 + $0x38] sm:$0xff] %vm182_vm1, %v766_v21 }
 0x196   :  { %v656_v22 = vpop.f32.mrf.mxu1 }
 0x197   :  { %666 = vst.msk [vmem:[#allocation2 + $0x30] sm:$0xff] %vm182_vm1, %v656_v22 }
 0x198   :  { %781 = shalt.err (!%p778_p4)
}
 0x199   :  { %s793_s26 = smov 128   ;;  %s794_s27 = smov 8  }
 0x19a   :  { %679 = dma.vmem_to_hbm [thread:$0]  %s674_s2, 1024, %s866_s3, [#allocation3], %s793_s26, %s793_s26, %s794_s27  }
 0x19b   :  { %790 = dma.done.wait [#allocation3], 1024  }
 0x19c   :  { %791 = vsyncadd [#allocation3], 4294966272 }
 0x19d   :  { %683 = vsyncpa [#allocation3], 1 }

</bundles_post_ra>
